<compile_context>
chip_gen: v7x
topology: tpu7x:2x2x1
jax: 0.10.0
libtpu: 0.0.40
codegen_flags: <defaults>
</compile_context>

<pallas_src>
import functools

import jax
import jax.numpy as jnp
from jax.experimental import pallas as pl
from jax.experimental.pallas import tpu as pltpu


D_IN = 256        # prompt_proj input dim  (nn.Linear(256, 768))
D_OUT = 768       # prompt_proj output dim (6 * 128 -> lane-dense output)
L = 8             # prompt length (rows produced by the prompt encoder per item)
N_PROMPTS = 16    # number of distinct prompts in the prompt map
MAX_ITEM_ID = 64  # id_map domain size
TB = 16           # default items per grid step -> TB * L = 128 output rows


def _make_kernel(block_items):
    def kernel(ids_ref, table_ref, w_ref, bias_ref, out_ref, proj_ref):
        # ids_ref   : SMEM  [B_pad] int32 (scalar prefetch) -- remapped prompt ids
        # table_ref : VMEM  (N_PROMPTS*L, D_IN)  bf16  -- flattened prompt table
        # w_ref     : VMEM  (D_IN, D_OUT)        bf16  -- prompt_proj.weight.T
        # bias_ref  : VMEM  (1, D_OUT)           f32   -- prompt_proj.bias
        # out_ref   : VMEM  (block_items*L, D_OUT) f32
        # proj_ref  : VMEM scratch (N_PROMPTS*L, D_OUT) f32 -- projected table

        # 1) Dedupe: project the whole prompt table once per grid step as a
        #    single MXU matmul + fused bias.  Recomputed per step (~50 MFLOP,
        #    hides under the output writeback DMA) so grid steps stay fully
        #    independent and the batch axis can be "parallel".
        proj_ref[...] = (
            jnp.dot(table_ref[...], w_ref[...],
                    preferred_element_type=jnp.float32)
            + bias_ref[...])

        # 2) Gather this step's block_items items (L rows each) out of the
        #    projected table: scalar SMEM id read + sublane-aligned VMEM copy.
        base = pl.program_id(0) * block_items
        for j in range(block_items):             # static unroll (small, fixed)
            pid = ids_ref[base + j]               # scalar read from SMEM
            row = pl.multiple_of(pid * L, L)      # L = 8 -> sublane aligned
            out_ref[pl.ds(j * L, L), :] = proj_ref[pl.ds(row, L), :]

    return kernel


@functools.partial(jax.jit, static_argnames=("block_items",))
def _prompt_encoder_impl(item_ids, id_map, prompt_table, w, bias, block_items):
    B = item_ids.shape[0]

    # Glue for the original module's python-dict id remap: dense lookup,
    # clamped so a bad id can never drive an OOB VMEM read inside the kernel.
    mapped = jnp.take(id_map, item_ids).astype(jnp.int32)
    mapped = jnp.clip(mapped, 0, N_PROMPTS - 1)

    # Pad the batch to a multiple of block_items (pad ids = 0, a valid prompt
    # row; padded outputs are sliced away below).
    b_pad = pl.cdiv(B, block_items) * block_items
    mapped = jnp.pad(mapped, (0, b_pad - B))

    # bf16 matmul operands (one-time wrapper cast), f32 bias / accum / output.
    table_flat = prompt_table.reshape(N_PROMPTS * L, D_IN).astype(jnp.bfloat16)
    w_bf16 = w.astype(jnp.bfloat16)
    bias2d = bias.reshape(1, D_OUT).astype(jnp.float32)

    rows_per_block = block_items * L

    grid_spec = pltpu.PrefetchScalarGridSpec(
        num_scalar_prefetch=1,
        grid=(b_pad // block_items,),
        in_specs=[
            # Whole-array constant blocks: block index never changes, so each
            # is DMA'd from HBM exactly once and stays resident in VMEM.
            pl.BlockSpec((N_PROMPTS * L, D_IN), lambda i, ids: (0, 0)),
            pl.BlockSpec((D_IN, D_OUT), lambda i, ids: (0, 0)),
            pl.BlockSpec((1, D_OUT), lambda i, ids: (0, 0)),
        ],
        out_specs=pl.BlockSpec((rows_per_block, D_OUT), lambda i, ids: (i, 0)),
        scratch_shapes=[pltpu.VMEM((N_PROMPTS * L, D_OUT), jnp.float32)],
    )

    out = pl.pallas_call(
        _make_kernel(block_items),
        out_shape=jax.ShapeDtypeStruct((b_pad * L, D_OUT), jnp.float32),
        grid_spec=grid_spec,
        compiler_params=pltpu.CompilerParams(
            dimension_semantics=("parallel",)),
    )(mapped, table_flat, w_bf16, bias2d)

    return out.reshape(b_pad, L, D_OUT)[:B]


def prompt_encoder_forward(item_ids, id_map, prompt_table, w, bias,
                           *, block_items=None):
    """Pallas implementation of PromptEncoder.forward.

    item_ids     : int32 [B]
    id_map       : int32 [MAX_ITEM_ID]          (python dict -> dense lookup)
    prompt_table : f32   [N_PROMPTS, L, D_IN]   (stand-in for PKGM output)
    w            : f32   [D_IN, D_OUT]          (prompt_proj.weight.T)
    bias         : f32   [D_OUT]                (prompt_proj.bias)
    returns      : f32   [B, L, D_OUT]
    """
    if block_items is None:
        B = item_ids.shape[0]
        # Small batches: keep padding waste low.  Large batches: 64 items
        # (512 output rows, ~1.5 MiB block) per step to amortize the
        # ~0.35 us/step pipeline overhead; total VMEM stays ~4.5 MiB.
        block_items = TB if B <= 8 * TB else 4 * TB
    return _prompt_encoder_impl(item_ids, id_map, prompt_table, w, bias,
                                block_items=block_items)


def _reference(item_ids, id_map, prompt_table, w, bias):
    # Matches the kernel's numerics: bf16 matmul operands, f32 accumulation.
    mapped = jnp.clip(jnp.take(id_map, item_ids), 0, N_PROMPTS - 1)
    x = prompt_table[mapped].astype(jnp.bfloat16)              # [B, L, D_IN]
    y = jnp.einsum("bld,do->blo", x, w.astype(jnp.bfloat16),
                   preferred_element_type=jnp.float32)
    return y + bias.astype(jnp.float32)


if __name__ == "__main__":
    key = jax.random.PRNGKey(0)
    k1, k2, k3, k4 = jax.random.split(key, 4)

    # Deterministic synthetic parameters / buffers.
    prompt_table = jax.random.normal(k1, (N_PROMPTS, L, D_IN), jnp.float32) * 0.02
    w = jax.random.normal(k2, (D_IN, D_OUT), jnp.float32) * 0.02  # weight.T
    bias = jax.random.normal(k3, (D_OUT,), jnp.float32) * 0.02    # bias
    # id_map: dense permutation-style lookup table item_id -> prompt row.
    id_map = (jnp.arange(MAX_ITEM_ID, dtype=jnp.int32) * 7 + 3) % N_PROMPTS

    # Small batch of item ids.
    item_ids = jax.random.randint(k4, (2,), 0, MAX_ITEM_ID, dtype=jnp.int32)

    out = prompt_encoder_forward(item_ids, id_map, prompt_table, w, bias)
    out = jax.block_until_ready(out)

    ref = _reference(item_ids, id_map, prompt_table, w, bias)
    assert out.shape == (2, L, D_OUT), out.shape
    assert jnp.allclose(out, ref, atol=1e-3, rtol=1e-3), "mismatch vs reference"

    print("KERNEL_OK")
</pallas_src>

<mosaic_0001>
module attributes {stable_mosaic.version = 11 : i64} {
  func.func @kernel(%arg0: i32, %arg1: memref<16xi32, #tpu.memory_space<smem>>, %arg2: memref<128x256xbf16, #tpu.memory_space<vmem>>, %arg3: memref<256x768xbf16, #tpu.memory_space<vmem>>, %arg4: memref<1x768xf32, #tpu.memory_space<vmem>>, %arg5: memref<128x768xf32, #tpu.memory_space<vmem>>, %arg6: memref<128x768xf32, #tpu.memory_space<vmem>>) attributes {dimension_semantics = [#tpu.dimension_semantics<parallel>], iteration_bounds = array<i64: 1>, scalar_prefetch = 1 : i64, scratch_operands = 1 : i64, tpu.core_type = #tpu.core_type<tc>, window_params = [{pipeline_mode = #tpu.pipeline_mode<synchronous>, transform_indices = @transform_0, window_bounds = array<i64: 128, 256>}, {pipeline_mode = #tpu.pipeline_mode<synchronous>, transform_indices = @transform_1, window_bounds = array<i64: 256, 768>}, {pipeline_mode = #tpu.pipeline_mode<synchronous>, transform_indices = @transform_2, window_bounds = array<i64: 1, 768>}, {transform_indices = @transform_3, window_bounds = array<i64: 128, 768>}]} {
    %c0 = arith.constant 0 : index
    %c0_0 = arith.constant 0 : index
    %0 = vector.load %arg2[%c0, %c0_0] : memref<128x256xbf16, #tpu.memory_space<vmem>>, vector<128x256xbf16>
    %c0_1 = arith.constant 0 : index
    %c0_2 = arith.constant 0 : index
    %1 = vector.load %arg3[%c0_1, %c0_2] : memref<256x768xbf16, #tpu.memory_space<vmem>>, vector<256x768xbf16>
    %cst = arith.constant dense<0.000000e+00> : vector<128x768xf32>
    %2 = tpu.matmul %0, %1, %cst {dimension_numbers = #tpu.dot_dimension_numbers<[1], [0], [0], [1], [0, 0, 1, 1], [], []>} : vector<128x256xbf16>, vector<256x768xbf16>, vector<128x768xf32> -> vector<128x768xf32>
    %c0_3 = arith.constant 0 : index
    %c0_4 = arith.constant 0 : index
    %3 = vector.load %arg4[%c0_3, %c0_4] : memref<1x768xf32, #tpu.memory_space<vmem>>, vector<1x768xf32>
    %4 = vector.broadcast %3 : vector<1x768xf32> to vector<128x768xf32>
    %5 = arith.addf %2, %4 : vector<128x768xf32>
    %c0_5 = arith.constant 0 : index
    %c0_6 = arith.constant 0 : index
    %6 = vector.load %arg6[%c0_5, %c0_6] : memref<128x768xf32, #tpu.memory_space<vmem>>, vector<128x768xf32>
    tpu.vector_store %arg6[%c0_5, %c0_6], %5 {strides = array<i32>} : memref<128x768xf32, #tpu.memory_space<vmem>>, vector<128x768xf32>,
    %c16_i32 = arith.constant 16 : i32
    %7 = arith.muli %arg0, %c16_i32 : i32
    %c0_i32 = arith.constant 0 : i32
    %8 = arith.addi %7, %c0_i32 : i32
    %9 = arith.index_cast %8 : i32 to index
    %10 = memref.load %arg1[%9] : memref<16xi32, #tpu.memory_space<smem>>
    %c8_i32 = arith.constant 8 : i32
    %11 = arith.muli %10, %c8_i32 : i32
    %12 = tpu.assume_multiple %11, 8 : i32
    %13 = arith.index_cast %12 : i32 to index
    %c0_7 = arith.constant 0 : index
    %14 = vector.load %arg6[%13, %c0_7] : memref<128x768xf32, #tpu.memory_space<vmem>>, vector<8x768xf32>
    %c0_8 = arith.constant 0 : index
    %c0_9 = arith.constant 0 : index
    %15 = vector.load %arg5[%c0_8, %c0_9] : memref<128x768xf32, #tpu.memory_space<vmem>>, vector<8x768xf32>
    tpu.vector_store %arg5[%c0_8, %c0_9], %14 {strides = array<i32>} : memref<128x768xf32, #tpu.memory_space<vmem>>, vector<8x768xf32>,
    %c1_i32 = arith.constant 1 : i32
    %16 = arith.addi %7, %c1_i32 : i32
    %17 = arith.index_cast %16 : i32 to index
    %18 = memref.load %arg1[%17] : memref<16xi32, #tpu.memory_space<smem>>
    %c8_i32_10 = arith.constant 8 : i32
    %19 = arith.muli %18, %c8_i32_10 : i32
    %20 = tpu.assume_multiple %19, 8 : i32
    %21 = arith.index_cast %20 : i32 to index
    %c0_11 = arith.constant 0 : index
    %22 = vector.load %arg6[%21, %c0_11] : memref<128x768xf32, #tpu.memory_space<vmem>>, vector<8x768xf32>
    %c8 = arith.constant 8 : index
    %c0_12 = arith.constant 0 : index
    %23 = vector.load %arg5[%c8, %c0_12] : memref<128x768xf32, #tpu.memory_space<vmem>>, vector<8x768xf32>
    tpu.vector_store %arg5[%c8, %c0_12], %22 {strides = array<i32>} : memref<128x768xf32, #tpu.memory_space<vmem>>, vector<8x768xf32>,
    %c2_i32 = arith.constant 2 : i32
    %24 = arith.addi %7, %c2_i32 : i32
    %25 = arith.index_cast %24 : i32 to index
    %26 = memref.load %arg1[%25] : memref<16xi32, #tpu.memory_space<smem>>
    %c8_i32_13 = arith.constant 8 : i32
    %27 = arith.muli %26, %c8_i32_13 : i32
    %28 = tpu.assume_multiple %27, 8 : i32
    %29 = arith.index_cast %28 : i32 to index
    %c0_14 = arith.constant 0 : index
    %30 = vector.load %arg6[%29, %c0_14] : memref<128x768xf32, #tpu.memory_space<vmem>>, vector<8x768xf32>
    %c16 = arith.constant 16 : index
    %c0_15 = arith.constant 0 : index
    %31 = vector.load %arg5[%c16, %c0_15] : memref<128x768xf32, #tpu.memory_space<vmem>>, vector<8x768xf32>
    tpu.vector_store %arg5[%c16, %c0_15], %30 {strides = array<i32>} : memref<128x768xf32, #tpu.memory_space<vmem>>, vector<8x768xf32>,
    %c3_i32 = arith.constant 3 : i32
    %32 = arith.addi %7, %c3_i32 : i32
    %33 = arith.index_cast %32 : i32 to index
    %34 = memref.load %arg1[%33] : memref<16xi32, #tpu.memory_space<smem>>
    %c8_i32_16 = arith.constant 8 : i32
    %35 = arith.muli %34, %c8_i32_16 : i32
    %36 = tpu.assume_multiple %35, 8 : i32
    %37 = arith.index_cast %36 : i32 to index
    %c0_17 = arith.constant 0 : index
    %38 = vector.load %arg6[%37, %c0_17] : memref<128x768xf32, #tpu.memory_space<vmem>>, vector<8x768xf32>
    %c24 = arith.constant 24 : index
    %c0_18 = arith.constant 0 : index
    %39 = vector.load %arg5[%c24, %c0_18] : memref<128x768xf32, #tpu.memory_space<vmem>>, vector<8x768xf32>
    tpu.vector_store %arg5[%c24, %c0_18], %38 {strides = array<i32>} : memref<128x768xf32, #tpu.memory_space<vmem>>, vector<8x768xf32>,
    %c4_i32 = arith.constant 4 : i32
    %40 = arith.addi %7, %c4_i32 : i32
    %41 = arith.index_cast %40 : i32 to index
    %42 = memref.load %arg1[%41] : memref<16xi32, #tpu.memory_space<smem>>
    %c8_i32_19 = arith.constant 8 : i32
    %43 = arith.muli %42, %c8_i32_19 : i32
    %44 = tpu.assume_multiple %43, 8 : i32
    %45 = arith.index_cast %44 : i32 to index
    %c0_20 = arith.constant 0 : index
    %46 = vector.load %arg6[%45, %c0_20] : memref<128x768xf32, #tpu.memory_space<vmem>>, vector<8x768xf32>
    %c32 = arith.constant 32 : index
    %c0_21 = arith.constant 0 : index
    %47 = vector.load %arg5[%c32, %c0_21] : memref<128x768xf32, #tpu.memory_space<vmem>>, vector<8x768xf32>
    tpu.vector_store %arg5[%c32, %c0_21], %46 {strides = array<i32>} : memref<128x768xf32, #tpu.memory_space<vmem>>, vector<8x768xf32>,
    %c5_i32 = arith.constant 5 : i32
    %48 = arith.addi %7, %c5_i32 : i32
    %49 = arith.index_cast %48 : i32 to index
    %50 = memref.load %arg1[%49] : memref<16xi32, #tpu.memory_space<smem>>
    %c8_i32_22 = arith.constant 8 : i32
    %51 = arith.muli %50, %c8_i32_22 : i32
    %52 = tpu.assume_multiple %51, 8 : i32
    %53 = arith.index_cast %52 : i32 to index
    %c0_23 = arith.constant 0 : index
    %54 = vector.load %arg6[%53, %c0_23] : memref<128x768xf32, #tpu.memory_space<vmem>>, vector<8x768xf32>
    %c40 = arith.constant 40 : index
    %c0_24 = arith.constant 0 : index
    %55 = vector.load %arg5[%c40, %c0_24] : memref<128x768xf32, #tpu.memory_space<vmem>>, vector<8x768xf32>
    tpu.vector_store %arg5[%c40, %c0_24], %54 {strides = array<i32>} : memref<128x768xf32, #tpu.memory_space<vmem>>, vector<8x768xf32>,
    %c6_i32 = arith.constant 6 : i32
    %56 = arith.addi %7, %c6_i32 : i32
    %57 = arith.index_cast %56 : i32 to index
    %58 = memref.load %arg1[%57] : memref<16xi32, #tpu.memory_space<smem>>
    %c8_i32_25 = arith.constant 8 : i32
    %59 = arith.muli %58, %c8_i32_25 : i32
    %60 = tpu.assume_multiple %59, 8 : i32
    %61 = arith.index_cast %60 : i32 to index
    %c0_26 = arith.constant 0 : index
    %62 = vector.load %arg6[%61, %c0_26] : memref<128x768xf32, #tpu.memory_space<vmem>>, vector<8x768xf32>
    %c48 = arith.constant 48 : index
    %c0_27 = arith.constant 0 : index
    %63 = vector.load %arg5[%c48, %c0_27] : memref<128x768xf32, #tpu.memory_space<vmem>>, vector<8x768xf32>
    tpu.vector_store %arg5[%c48, %c0_27], %62 {strides = array<i32>} : memref<128x768xf32, #tpu.memory_space<vmem>>, vector<8x768xf32>,
    %c7_i32 = arith.constant 7 : i32
    %64 = arith.addi %7, %c7_i32 : i32
    %65 = arith.index_cast %64 : i32 to index
    %66 = memref.load %arg1[%65] : memref<16xi32, #tpu.memory_space<smem>>
    %c8_i32_28 = arith.constant 8 : i32
    %67 = arith.muli %66, %c8_i32_28 : i32
    %68 = tpu.assume_multiple %67, 8 : i32
    %69 = arith.index_cast %68 : i32 to index
    %c0_29 = arith.constant 0 : index
    %70 = vector.load %arg6[%69, %c0_29] : memref<128x768xf32, #tpu.memory_space<vmem>>, vector<8x768xf32>
    %c56 = arith.constant 56 : index
    %c0_30 = arith.constant 0 : index
    %71 = vector.load %arg5[%c56, %c0_30] : memref<128x768xf32, #tpu.memory_space<vmem>>, vector<8x768xf32>
    tpu.vector_store %arg5[%c56, %c0_30], %70 {strides = array<i32>} : memref<128x768xf32, #tpu.memory_space<vmem>>, vector<8x768xf32>,
    %c8_i32_31 = arith.constant 8 : i32
    %72 = arith.addi %7, %c8_i32_31 : i32
    %73 = arith.index_cast %72 : i32 to index
    %74 = memref.load %arg1[%73] : memref<16xi32, #tpu.memory_space<smem>>
    %c8_i32_32 = arith.constant 8 : i32
    %75 = arith.muli %74, %c8_i32_32 : i32
    %76 = tpu.assume_multiple %75, 8 : i32
    %77 = arith.index_cast %76 : i32 to index
    %c0_33 = arith.constant 0 : index
    %78 = vector.load %arg6[%77, %c0_33] : memref<128x768xf32, #tpu.memory_space<vmem>>, vector<8x768xf32>
    %c64 = arith.constant 64 : index
    %c0_34 = arith.constant 0 : index
    %79 = vector.load %arg5[%c64, %c0_34] : memref<128x768xf32, #tpu.memory_space<vmem>>, vector<8x768xf32>
    tpu.vector_store %arg5[%c64, %c0_34], %78 {strides = array<i32>} : memref<128x768xf32, #tpu.memory_space<vmem>>, vector<8x768xf32>,
    %c9_i32 = arith.constant 9 : i32
    %80 = arith.addi %7, %c9_i32 : i32
    %81 = arith.index_cast %80 : i32 to index
    %82 = memref.load %arg1[%81] : memref<16xi32, #tpu.memory_space<smem>>
    %c8_i32_35 = arith.constant 8 : i32
    %83 = arith.muli %82, %c8_i32_35 : i32
    %84 = tpu.assume_multiple %83, 8 : i32
    %85 = arith.index_cast %84 : i32 to index
    %c0_36 = arith.constant 0 : index
    %86 = vector.load %arg6[%85, %c0_36] : memref<128x768xf32, #tpu.memory_space<vmem>>, vector<8x768xf32>
    %c72 = arith.constant 72 : index
    %c0_37 = arith.constant 0 : index
    %87 = vector.load %arg5[%c72, %c0_37] : memref<128x768xf32, #tpu.memory_space<vmem>>, vector<8x768xf32>
    tpu.vector_store %arg5[%c72, %c0_37], %86 {strides = array<i32>} : memref<128x768xf32, #tpu.memory_space<vmem>>, vector<8x768xf32>,
    %c10_i32 = arith.constant 10 : i32
    %88 = arith.addi %7, %c10_i32 : i32
    %89 = arith.index_cast %88 : i32 to index
    %90 = memref.load %arg1[%89] : memref<16xi32, #tpu.memory_space<smem>>
    %c8_i32_38 = arith.constant 8 : i32
    %91 = arith.muli %90, %c8_i32_38 : i32
    %92 = tpu.assume_multiple %91, 8 : i32
    %93 = arith.index_cast %92 : i32 to index
    %c0_39 = arith.constant 0 : index
    %94 = vector.load %arg6[%93, %c0_39] : memref<128x768xf32, #tpu.memory_space<vmem>>, vector<8x768xf32>
    %c80 = arith.constant 80 : index
    %c0_40 = arith.constant 0 : index
    %95 = vector.load %arg5[%c80, %c0_40] : memref<128x768xf32, #tpu.memory_space<vmem>>, vector<8x768xf32>
    tpu.vector_store %arg5[%c80, %c0_40], %94 {strides = array<i32>} : memref<128x768xf32, #tpu.memory_space<vmem>>, vector<8x768xf32>,
    %c11_i32 = arith.constant 11 : i32
    %96 = arith.addi %7, %c11_i32 : i32
    %97 = arith.index_cast %96 : i32 to index
    %98 = memref.load %arg1[%97] : memref<16xi32, #tpu.memory_space<smem>>
    %c8_i32_41 = arith.constant 8 : i32
    %99 = arith.muli %98, %c8_i32_41 : i32
    %100 = tpu.assume_multiple %99, 8 : i32
    %101 = arith.index_cast %100 : i32 to index
    %c0_42 = arith.constant 0 : index
    %102 = vector.load %arg6[%101, %c0_42] : memref<128x768xf32, #tpu.memory_space<vmem>>, vector<8x768xf32>
    %c88 = arith.constant 88 : index
    %c0_43 = arith.constant 0 : index
    %103 = vector.load %arg5[%c88, %c0_43] : memref<128x768xf32, #tpu.memory_space<vmem>>, vector<8x768xf32>
    tpu.vector_store %arg5[%c88, %c0_43], %102 {strides = array<i32>} : memref<128x768xf32, #tpu.memory_space<vmem>>, vector<8x768xf32>,
    %c12_i32 = arith.constant 12 : i32
    %104 = arith.addi %7, %c12_i32 : i32
    %105 = arith.index_cast %104 : i32 to index
    %106 = memref.load %arg1[%105] : memref<16xi32, #tpu.memory_space<smem>>
    %c8_i32_44 = arith.constant 8 : i32
    %107 = arith.muli %106, %c8_i32_44 : i32
    %108 = tpu.assume_multiple %107, 8 : i32
    %109 = arith.index_cast %108 : i32 to index
    %c0_45 = arith.constant 0 : index
    %110 = vector.load %arg6[%109, %c0_45] : memref<128x768xf32, #tpu.memory_space<vmem>>, vector<8x768xf32>
    %c96 = arith.constant 96 : index
    %c0_46 = arith.constant 0 : index
    %111 = vector.load %arg5[%c96, %c0_46] : memref<128x768xf32, #tpu.memory_space<vmem>>, vector<8x768xf32>
    tpu.vector_store %arg5[%c96, %c0_46], %110 {strides = array<i32>} : memref<128x768xf32, #tpu.memory_space<vmem>>, vector<8x768xf32>,
    %c13_i32 = arith.constant 13 : i32
    %112 = arith.addi %7, %c13_i32 : i32
    %113 = arith.index_cast %112 : i32 to index
    %114 = memref.load %arg1[%113] : memref<16xi32, #tpu.memory_space<smem>>
    %c8_i32_47 = arith.constant 8 : i32
    %115 = arith.muli %114, %c8_i32_47 : i32
    %116 = tpu.assume_multiple %115, 8 : i32
    %117 = arith.index_cast %116 : i32 to index
    %c0_48 = arith.constant 0 : index
    %118 = vector.load %arg6[%117, %c0_48] : memref<128x768xf32, #tpu.memory_space<vmem>>, vector<8x768xf32>
    %c104 = arith.constant 104 : index
    %c0_49 = arith.constant 0 : index
    %119 = vector.load %arg5[%c104, %c0_49] : memref<128x768xf32, #tpu.memory_space<vmem>>, vector<8x768xf32>
    tpu.vector_store %arg5[%c104, %c0_49], %118 {strides = array<i32>} : memref<128x768xf32, #tpu.memory_space<vmem>>, vector<8x768xf32>,
    %c14_i32 = arith.constant 14 : i32
    %120 = arith.addi %7, %c14_i32 : i32
    %121 = arith.index_cast %120 : i32 to index
    %122 = memref.load %arg1[%121] : memref<16xi32, #tpu.memory_space<smem>>
    %c8_i32_50 = arith.constant 8 : i32
    %123 = arith.muli %122, %c8_i32_50 : i32
    %124 = tpu.assume_multiple %123, 8 : i32
    %125 = arith.index_cast %124 : i32 to index
    %c0_51 = arith.constant 0 : index
    %126 = vector.load %arg6[%125, %c0_51] : memref<128x768xf32, #tpu.memory_space<vmem>>, vector<8x768xf32>
    %c112 = arith.constant 112 : index
    %c0_52 = arith.constant 0 : index
    %127 = vector.load %arg5[%c112, %c0_52] : memref<128x768xf32, #tpu.memory_space<vmem>>, vector<8x768xf32>
    tpu.vector_store %arg5[%c112, %c0_52], %126 {strides = array<i32>} : memref<128x768xf32, #tpu.memory_space<vmem>>, vector<8x768xf32>,
    %c15_i32 = arith.constant 15 : i32
    %128 = arith.addi %7, %c15_i32 : i32
    %129 = arith.index_cast %128 : i32 to index
    %130 = memref.load %arg1[%129] : memref<16xi32, #tpu.memory_space<smem>>
    %c8_i32_53 = arith.constant 8 : i32
    %131 = arith.muli %130, %c8_i32_53 : i32
    %132 = tpu.assume_multiple %131, 8 : i32
    %133 = arith.index_cast %132 : i32 to index
    %c0_54 = arith.constant 0 : index
    %134 = vector.load %arg6[%133, %c0_54] : memref<128x768xf32, #tpu.memory_space<vmem>>, vector<8x768xf32>
    %c120 = arith.constant 120 : index
    %c0_55 = arith.constant 0 : index
    %135 = vector.load %arg5[%c120, %c0_55] : memref<128x768xf32, #tpu.memory_space<vmem>>, vector<8x768xf32>
    tpu.vector_store %arg5[%c120, %c0_55], %134 {strides = array<i32>} : memref<128x768xf32, #tpu.memory_space<vmem>>, vector<8x768xf32>,
    return
  }
  func.func @transform_0(%arg0: i32, %arg1: memref<16xi32, #tpu.memory_space<smem>>) -> (i32, i32) {
    %c0_i32 = arith.constant 0 : i32
    %c0_i32_0 = arith.constant 0 : i32
    %c0_i32_1 = arith.constant 0 : i32
    return %c0_i32, %c0_i32_0 : i32, i32
  }
  func.func @transform_1(%arg0: i32, %arg1: memref<16xi32, #tpu.memory_space<smem>>) -> (i32, i32) {
    %c0_i32 = arith.constant 0 : i32
    %c0_i32_0 = arith.constant 0 : i32
    %c0_i32_1 = arith.constant 0 : i32
    return %c0_i32, %c0_i32_0 : i32, i32
  }
  func.func @transform_2(%arg0: i32, %arg1: memref<16xi32, #tpu.memory_space<smem>>) -> (i32, i32) {
    %c0_i32 = arith.constant 0 : i32
    %c0_i32_0 = arith.constant 0 : i32
    %c0_i32_1 = arith.constant 0 : i32
    return %c0_i32, %c0_i32_0 : i32, i32
  }
  func.func @transform_3(%arg0: i32, %arg1: memref<16xi32, #tpu.memory_space<smem>>) -> (i32, i32) {
    %c0_i32 = arith.constant 0 : i32
    %c0_i32_0 = arith.constant 0 : i32
    return %arg0, %c0_i32 : i32, i32
  }
}

</mosaic_0001>

<bundles_post_ra>
// kernel: _prompt_encoder_impl.1
= control target key start
LH: loop header
LB: loop body
LE: loop exit
PB: predicated region body
PF: predicated region fallthrough
CT: control target
= control target key end

     0   :  { %s2869_s0 = inlined_call_operand.vmem [shape: s32[16], index: 0, kind: input, shape index: {}]   ;;  %s2870_s1 = inlined_call_operand.vmem [shape: bf16[128,256], index: 1, kind: input, shape index: {}]   ;;  %s2871_s2 = inlined_call_operand.vmem [shape: bf16[256,768], index: 2, kind: input, shape index: {}]   ;;  %s2872_s3 = inlined_call_operand.vmem [shape: f32[1,768], index: 3, kind: input, shape index: {}]   ;;  %s2873_s4 = inlined_call_operand.vmem [shape: f32[128,768], index: 4, kind: output, shape index: {}]  }
   0x1   :  { %s9_s17 = sshll.u32 %s2869_s0, 4  ;;  %s10_s17 = int_to_ptr.vmem [resolvable:$true] %s9_s17 }
   0x2   :  { %s1892_s18 = scalar_lea.vmem %s10_s17, 16  ;;  %p1897_p1 = scmp.lt.s32.totalorder %s10_s17, %s10_s17 }
   0x3   :  { %p1893_p0 = scmp.ne.s32.totalorder %s10_s17, %s1892_s18  ;;  %p1898_p2 = scmp.lt.s32.totalorder %s1892_s18, %s1892_s18 }
   0x5   :  { %p1899_p3 = por %p1898_p2, %p1897_p1 }
   0x7   :  { %p1900_p4 = pnand %p1899_p3, %p1893_p0 }
   0x9   :  { %1903 = shalt.err (!%p1900_p4)  }
   0xa   :  { %s1906_s19 = smov [#allocation4]  }
   0xb   :  { %12 = dma.vmem_to_smem %s10_s17, 16, %s1906_s19, [#allocation3] }
   0xc   :  { %1904 = dma.done.wait [#allocation3], 16 }
   0xd   :  { %1905 = vsyncadd [#allocation3], 4294967280 }
   0xe   :  { %14 = sfence }
   0xf   :  { %v1724_v0 = vld [vmem:[%s2871_s2 + $0x4] ss:$24 sps:$4 sm:$0xff]   ;;  %v1728_v2 = vld [vmem:[%s2871_s2] ss:$24 sps:$4 sm:$0xff]   ;;  %v1730_v4 = vld [vmem:[%s2871_s2 + $0x34] ss:$24 sps:$4 sm:$0xff]  }
  0x10   :  { %v1726_v1 = vld [vmem:[%s2871_s2 + $0xc] ss:$24 sps:$4 sm:$0xff]   ;;  %725 = vmatprep.subr.bf16.mxu0 %v1724_v0  ;;  %v1729_v3 = vld [vmem:[%s2871_s2 + $0x8] ss:$24 sps:$4 sm:$0xff]   ;;  %v1732_v5 = vld [vmem:[%s2871_s2 + $0x3c] ss:$24 sps:$4 sm:$0xff]  }
  0x11   :  { %838 = vmatprep.subr.bf16.mxu1 %v1726_v1  ;;  %726 = vmatpush1.bf16.msra.mxu0 %v1728_v2  ;;  %v1734_v6 = vld [vmem:[%s2871_s2 + $0x30] ss:$24 sps:$4 sm:$0xff]   ;;  %v1736_v8 = vld [vmem:[%s2871_s2 + $0x64] ss:$24 sps:$4 sm:$0xff]   ;;  %v1740_v10 = vld [vmem:[%s2871_s2 + $0x60] ss:$24 sps:$4 sm:$0xff]  }
  0x12   :  { %839 = vmatpush1.bf16.msra.mxu1 %v1729_v3  ;;  %727 = vmatprep.subr.bf16.mxu0 %v1730_v4  ;;  %v1735_v7 = vld [vmem:[%s2871_s2 + $0x38] ss:$24 sps:$4 sm:$0xff]   ;;  %v1738_v9 = vld [vmem:[%s2871_s2 + $0x6c] ss:$24 sps:$4 sm:$0xff]   ;;  %v1741_v11 = vld [vmem:[%s2871_s2 + $0x68] ss:$24 sps:$4 sm:$0xff]  }
  0x13   :  { %840 = vmatprep.subr.bf16.mxu1 %v1732_v5  ;;  %v1742_v12 = vld [vmem:[%s2871_s2 + $0x94] ss:$24 sps:$4 sm:$0xff]   ;;  %v1746_v14 = vld [vmem:[%s2871_s2 + $0x90] ss:$24 sps:$4 sm:$0xff]   ;;  %v1748_v16 = vld [vmem:[%s2871_s2 + $0xc4] ss:$24 sps:$4 sm:$0xff]  }
  0x14   :  { %v1744_v13 = vld [vmem:[%s2871_s2 + $0x9c] ss:$24 sps:$4 sm:$0xff]   ;;  %v1747_v15 = vld [vmem:[%s2871_s2 + $0x98] ss:$24 sps:$4 sm:$0xff]   ;;  %v1750_v17 = vld [vmem:[%s2871_s2 + $0xcc] ss:$24 sps:$4 sm:$0xff]  }
  0x15   :  { %728 = vmatpush1.bf16.msra.mxu0 %v1734_v6  ;;  %v1752_v18 = vld [vmem:[%s2871_s2 + $0xc0] ss:$24 sps:$4 sm:$0xff]   ;;  %v1754_v20 = vld [vmem:[%s2871_s2 + $0xf4] ss:$24 sps:$4 sm:$0xff]   ;;  %v1758_v22 = vld [vmem:[%s2871_s2 + $0xf0] ss:$24 sps:$4 sm:$0xff]  }
  0x16   :  { %841 = vmatpush1.bf16.msra.mxu1 %v1735_v7  ;;  %729 = vmatprep.subr.bf16.mxu0 %v1736_v8  ;;  %v1753_v19 = vld [vmem:[%s2871_s2 + $0xc8] ss:$24 sps:$4 sm:$0xff]   ;;  %v1756_v21 = vld [vmem:[%s2871_s2 + $0xfc] ss:$24 sps:$4 sm:$0xff]   ;;  %v1759_v23 = vld [vmem:[%s2871_s2 + $0xf8] ss:$24 sps:$4 sm:$0xff]  }
  0x17   :  { %842 = vmatprep.subr.bf16.mxu1 %v1738_v9  ;;  %v1760_v24 = vld [vmem:[%s2871_s2 + $0x124] ss:$24 sps:$4 sm:$0xff]   ;;  %v1764_v26 = vld [vmem:[%s2871_s2 + $0x120] ss:$24 sps:$4 sm:$0xff]   ;;  %v1766_v28 = vld [vmem:[%s2871_s2 + $0x154] ss:$24 sps:$4 sm:$0xff]  }
  0x18   :  { %v1762_v25 = vld [vmem:[%s2871_s2 + $0x12c] ss:$24 sps:$4 sm:$0xff]   ;;  %v1765_v27 = vld [vmem:[%s2871_s2 + $0x128] ss:$24 sps:$4 sm:$0xff]   ;;  %v1768_v29 = vld [vmem:[%s2871_s2 + $0x15c] ss:$24 sps:$4 sm:$0xff]  }
  0x19   :  { %730 = vmatpush1.bf16.msra.mxu0 %v1740_v10  ;;  %v1770_v30 = vld [vmem:[%s2871_s2 + $0x150] ss:$24 sps:$4 sm:$0xff]   ;;  %v1772_v32 = vld [vmem:[%s2871_s2 + $0x184] ss:$24 sps:$4 sm:$0xff]   ;;  %v1776_v34 = vld [vmem:[%s2871_s2 + $0x180] ss:$24 sps:$4 sm:$0xff]  }
  0x1a   :  { %843 = vmatpush1.bf16.msra.mxu1 %v1741_v11  ;;  %731 = vmatprep.subr.bf16.mxu0 %v1742_v12  ;;  %v1771_v31 = vld [vmem:[%s2871_s2 + $0x158] ss:$24 sps:$4 sm:$0xff]   ;;  %v1774_v33 = vld [vmem:[%s2871_s2 + $0x18c] ss:$24 sps:$4 sm:$0xff]   ;;  %v1777_v35 = vld [vmem:[%s2871_s2 + $0x188] ss:$24 sps:$4 sm:$0xff]  }
  0x1b   :  { %844 = vmatprep.subr.bf16.mxu1 %v1744_v13  ;;  %v1778_v36 = vld [vmem:[%s2871_s2 + $0x1b4] ss:$24 sps:$4 sm:$0xff]   ;;  %v1782_v38 = vld [vmem:[%s2871_s2 + $0x1b0] ss:$24 sps:$4 sm:$0xff]   ;;  %v1784_v40 = vld [vmem:[%s2871_s2 + $0x1e4] ss:$24 sps:$4 sm:$0xff]  }
  0x1c   :  { %v1780_v37 = vld [vmem:[%s2871_s2 + $0x1bc] ss:$24 sps:$4 sm:$0xff]   ;;  %v1783_v39 = vld [vmem:[%s2871_s2 + $0x1b8] ss:$24 sps:$4 sm:$0xff]   ;;  %v1786_v41 = vld [vmem:[%s2871_s2 + $0x1ec] ss:$24 sps:$4 sm:$0xff]  }
  0x1d   :  { %732 = vmatpush1.bf16.msra.mxu0 %v1746_v14  ;;  %v1788_v42 = vld [vmem:[%s2871_s2 + $0x1e0] ss:$24 sps:$4 sm:$0xff]   ;;  %v1790_v44 = vld [vmem:[%s2871_s2 + $0x214] ss:$24 sps:$4 sm:$0xff]   ;;  %v1794_v46 = vld [vmem:[%s2871_s2 + $0x210] ss:$24 sps:$4 sm:$0xff]  }
  0x1e   :  { %845 = vmatpush1.bf16.msra.mxu1 %v1747_v15  ;;  %733 = vmatprep.subr.bf16.mxu0 %v1748_v16  ;;  %v1789_v43 = vld [vmem:[%s2871_s2 + $0x1e8] ss:$24 sps:$4 sm:$0xff]   ;;  %v1792_v45 = vld [vmem:[%s2871_s2 + $0x21c] ss:$24 sps:$4 sm:$0xff]   ;;  %v1795_v47 = vld [vmem:[%s2871_s2 + $0x218] ss:$24 sps:$4 sm:$0xff]  }
  0x1f   :  { %846 = vmatprep.subr.bf16.mxu1 %v1750_v17  ;;  %v2082_v48 = vld [vmem:[%s2870_s1 + $0x4] ss:$8 sps:$4 sm:$0xff]   ;;  %v1800_v51 = vld [vmem:[%s2871_s2 + $0x240] ss:$24 sps:$4 sm:$0xff]   ;;  %v1804_v54 = vld [vmem:[%s2871_s2 + $0x27c] ss:$24 sps:$4 sm:$0xff]  }
  0x20   :  { %v1796_v49 = vld [vmem:[%s2871_s2 + $0x244] ss:$24 sps:$4 sm:$0xff]   ;;  %757 = vmatprep.mubr.bf16.mxu0 %v2082_v48  ;;  %870 = vmatprep.mubr.bf16.mxu1 %v2082_v48  ;;  %v1801_v52 = vld [vmem:[%s2871_s2 + $0x248] ss:$24 sps:$4 sm:$0xff]   ;;  %v1802_v53 = vld [vmem:[%s2871_s2 + $0x274] ss:$24 sps:$4 sm:$0xff]  }
  0x21   :  { %734 = vmatpush1.bf16.msra.mxu0 %v1752_v18  ;;  %v1798_v50 = vld [vmem:[%s2871_s2 + $0x24c] ss:$24 sps:$4 sm:$0xff]   ;;  %v1806_v55 = vld [vmem:[%s2871_s2 + $0x270] ss:$24 sps:$4 sm:$0xff]   ;;  %v1812_v59 = vld [vmem:[%s2871_s2 + $0x2a0] ss:$24 sps:$4 sm:$0xff]  }
  0x22   :  { %847 = vmatpush1.bf16.msra.mxu1 %v1753_v19  ;;  %735 = vmatprep.subr.bf16.mxu0 %v1754_v20  ;;  %v1807_v56 = vld [vmem:[%s2871_s2 + $0x278] ss:$24 sps:$4 sm:$0xff]   ;;  %v1808_v57 = vld [vmem:[%s2871_s2 + $0x2a4] ss:$24 sps:$4 sm:$0xff]   ;;  %v1813_v60 = vld [vmem:[%s2871_s2 + $0x2a8] ss:$24 sps:$4 sm:$0xff]  }
  0x23   :  { %848 = vmatprep.subr.bf16.mxu1 %v1756_v21  ;;  %v1810_v58 = vld [vmem:[%s2871_s2 + $0x2ac] ss:$24 sps:$4 sm:$0xff]   ;;  %v1816_v62 = vld [vmem:[%s2871_s2 + $0x2dc] ss:$24 sps:$4 sm:$0xff]   ;;  %v1818_v63 = vld [vmem:[%s2871_s2 + $0x2d0] ss:$24 sps:$4 sm:$0xff]  }
  0x24   :  { %v1814_v61 = vld [vmem:[%s2871_s2 + $0x2d4] ss:$24 sps:$4 sm:$0xff]   ;;  %v1819_v0 = vld [vmem:[%s2871_s2 + $0x2d8] ss:$24 sps:$4 sm:$0xff]   ;;  %v2140_v2 = vld [vmem:[%s2870_s1] ss:$8 sps:$4 sm:$0xff]  }
  0x25   :  { %736 = vmatpush1.bf16.msra.mxu0 %v1758_v22  ;;  %v1825_v1 = vld [vmem:[%s2871_s2 + $0x14] ss:$24 sps:$4 sm:$0xff]   ;;  %v1823_v3 = vld [vmem:[%s2871_s2 + $0x10] ss:$24 sps:$4 sm:$0xff]   ;;  %v1828_v4 = vld [vmem:[%s2871_s2 + $0x44] ss:$24 sps:$4 sm:$0xff]  }
  0x26   :  { %849 = vmatpush1.bf16.msra.mxu1 %v1759_v23  ;;  %737 = vmatprep.subr.bf16.mxu0 %v1760_v24  ;;  %v2151_v5 = vld [vmem:[%s2870_s1 + $0x14] ss:$8 sps:$4 sm:$0xff]   ;;  %v1826_v6 = vld [vmem:[%s2871_s2 + $0x40] ss:$24 sps:$4 sm:$0xff]   ;;  %v1832_v9 = vld [vmem:[%s2871_s2 + $0x70] ss:$24 sps:$4 sm:$0xff]  }
  0x27   :  { %850 = vmatprep.subr.bf16.mxu1 %v1762_v25  ;;  %v1834_v7 = vld [vmem:[%s2871_s2 + $0x74] ss:$24 sps:$4 sm:$0xff]   ;;  %v2166_v8 = vld [vmem:[%s2870_s1 + $0x10] ss:$8 sps:$4 sm:$0xff]   ;;  %v1837_v10 = vld [vmem:[%s2871_s2 + $0xa4] ss:$24 sps:$4 sm:$0xff]  }
  0x28   :  { %v2177_v11 = vld [vmem:[%s2870_s1 + $0x24] ss:$8 sps:$4 sm:$0xff]   ;;  %v1835_v12 = vld [vmem:[%s2871_s2 + $0xa0] ss:$24 sps:$4 sm:$0xff]   ;;  %v1841_v15 = vld [vmem:[%s2871_s2 + $0xd0] ss:$24 sps:$4 sm:$0xff]  }
  0x29   :  { %738 = vmatpush1.bf16.msra.mxu0 %v1764_v26  ;;  %v1843_v13 = vld [vmem:[%s2871_s2 + $0xd4] ss:$24 sps:$4 sm:$0xff]   ;;  %v2192_v14 = vld [vmem:[%s2870_s1 + $0x20] ss:$8 sps:$4 sm:$0xff]   ;;  %v1846_v16 = vld [vmem:[%s2871_s2 + $0x104] ss:$24 sps:$4 sm:$0xff]  }
  0x2a   :  { %851 = vmatpush1.bf16.msra.mxu1 %v1765_v27  ;;  %739 = vmatprep.subr.bf16.mxu0 %v1766_v28  ;;  %v2203_v17 = vld [vmem:[%s2870_s1 + $0x34] ss:$8 sps:$4 sm:$0xff]   ;;  %v1844_v18 = vld [vmem:[%s2871_s2 + $0x100] ss:$24 sps:$4 sm:$0xff]   ;;  %v1850_v21 = vld [vmem:[%s2871_s2 + $0x130] ss:$24 sps:$4 sm:$0xff]  }
  0x2b   :  { %852 = vmatprep.subr.bf16.mxu1 %v1768_v29  ;;  %v1852_v19 = vld [vmem:[%s2871_s2 + $0x134] ss:$24 sps:$4 sm:$0xff]   ;;  %v2218_v20 = vld [vmem:[%s2870_s1 + $0x30] ss:$8 sps:$4 sm:$0xff]   ;;  %v1855_v22 = vld [vmem:[%s2871_s2 + $0x164] ss:$24 sps:$4 sm:$0xff]  }
  0x2c   :  { %v2229_v23 = vld [vmem:[%s2870_s1 + $0x44] ss:$8 sps:$4 sm:$0xff]   ;;  %v1853_v24 = vld [vmem:[%s2871_s2 + $0x160] ss:$24 sps:$4 sm:$0xff]   ;;  %v1859_v27 = vld [vmem:[%s2871_s2 + $0x190] ss:$24 sps:$4 sm:$0xff]  }
  0x2d   :  { %740 = vmatpush1.bf16.msra.mxu0 %v1770_v30  ;;  %v1861_v25 = vld [vmem:[%s2871_s2 + $0x194] ss:$24 sps:$4 sm:$0xff]   ;;  %v2244_v26 = vld [vmem:[%s2870_s1 + $0x40] ss:$8 sps:$4 sm:$0xff]   ;;  %v1864_v28 = vld [vmem:[%s2871_s2 + $0x1c4] ss:$24 sps:$4 sm:$0xff]  }
  0x2e   :  { %853 = vmatpush1.bf16.msra.mxu1 %v1771_v31  ;;  %741 = vmatprep.subr.bf16.mxu0 %v1772_v32  ;;  %v2255_v29 = vld [vmem:[%s2870_s1 + $0x54] ss:$8 sps:$4 sm:$0xff]   ;;  %v1862_v30 = vld [vmem:[%s2871_s2 + $0x1c0] ss:$24 sps:$4 sm:$0xff]   ;;  %s2439_s27 = sld [smem:[#allocation4 + $0x1]]  ;;  %s2441_s28 = sld [smem:[#allocation4 + $0x2]] }
  0x2f   :  { %854 = vmatprep.subr.bf16.mxu1 %v1774_v33  ;;  %v1870_v31 = vld [vmem:[%s2871_s2 + $0x1f4] ss:$24 sps:$4 sm:$0xff]   ;;  %v1867_v32 = vld [vmem:[%s2870_s1 + $0x50] ss:$8 sps:$4 sm:$0xff]   ;;  %s2445_s29 = sld [smem:[#allocation4 + $0x3]]  ;;  %s2451_s30 = sld [smem:[#allocation4 + $0x4]] }
  0x30   :  { %v1868_v33 = vld [vmem:[%s2871_s2 + $0x1f0] ss:$24 sps:$4 sm:$0xff]   ;;  %s2458_s8 = sld [smem:[#allocation4 + $0x5]]  ;;  %s2469_s13 = sld [smem:[#allocation4 + $0x6]] }
  0x31   :  { %742 = vmatpush1.bf16.msra.mxu0 %v1776_v34  ;;  %v1873_v34 = vld [vmem:[%s2871_s2 + $0x224] ss:$24 sps:$4 sm:$0xff]   ;;  %s2484_s20 = sld [smem:[#allocation4 + $0x7]]  ;;  %s2488_s22 = sld [smem:[#allocation4 + $0x8]] }
  0x32   :  { %855 = vmatpush1.bf16.msra.mxu1 %v1777_v35  ;;  %743 = vmatprep.subr.bf16.mxu0 %v1778_v36  ;;  %v1874_v35 = vld [vmem:[%s2870_s1 + $0x64] ss:$8 sps:$4 sm:$0xff]   ;;  %v1871_v36 = vld [vmem:[%s2871_s2 + $0x220] ss:$24 sps:$4 sm:$0xff]   ;;  %s2493_s24 = sld [smem:[#allocation4 + $0x9]] }
  0x33   :  { %856 = vmatprep.subr.bf16.mxu1 %v1780_v37  ;;  %v1879_v37 = vld [vmem:[%s2871_s2 + $0x254] ss:$24 sps:$4 sm:$0xff]  }
  0x34   :  { %s1631_s6 = sshll.u32 %s2439_s27, 3  ;;  %s1634_s7 = sshll.u32 %s2441_s28, 3 }
  0x35   :  { %744 = vmatpush1.bf16.msra.mxu0 %v1782_v38  ;;  %v1876_v38 = vld [vmem:[%s2870_s1 + $0x60] ss:$8 sps:$4 sm:$0xff]   ;;  %s2462_s10 = sshra.s32 %s1631_s6, 3  ;;  %s2464_s11 = sshra.s32 %s1634_s7, 3 }
  0x36   :  { %857 = vmatpush1.bf16.msra.mxu1 %v1783_v39  ;;  %745 = vmatprep.subr.bf16.mxu0 %v1784_v40  ;;  %v1877_v39 = vld [vmem:[%s2871_s2 + $0x250] ss:$24 sps:$4 sm:$0xff]   ;;  %v1882_v40 = vld [vmem:[%s2871_s2 + $0x284] ss:$24 sps:$4 sm:$0xff]   ;;  %s1637_s12 = sshll.u32 %s2445_s29, 3  ;;  %s1676_s15 = smul.u32 48, %s2462_s10 }
  0x37   :  { %858 = vmatprep.subr.bf16.mxu1 %v1786_v41  ;;  %v1883_v41 = vld [vmem:[%s2870_s1 + $0x74] ss:$8 sps:$4 sm:$0xff]   ;;  %s1640_s16 = sshll.u32 %s2451_s30, 3  ;;  %s1677_s17 = smul.u32 48, %s2464_s11 }
  0x38   :  { %s2481_s18 = sshra.s32 %s1637_s12, 3  ;;  %s1643_s19 = sshll.u32 %s2458_s8, 3 }
  0x39   :  { %746 = vmatpush1.bf16.msra.mxu0 %v1788_v42  ;;  %v1880_v42 = vld [vmem:[%s2871_s2 + $0x280] ss:$24 sps:$4 sm:$0xff]   ;;  %s2486_s21 = sshra.s32 %s1640_s16, 3  ;;  %s1678_s23 = smul.u32 48, %s2481_s18 }
  0x3a   :  { %859 = vmatpush1.bf16.msra.mxu1 %v1789_v43  ;;  %747 = vmatprep.subr.bf16.mxu0 %v1790_v44  ;;  %v1888_v43 = vld [vmem:[%s2871_s2 + $0x2b4] ss:$24 sps:$4 sm:$0xff]   ;;  %v1885_v44 = vld [vmem:[%s2870_s1 + $0x70] ss:$8 sps:$4 sm:$0xff]   ;;  %s2491_s0 = sshra.s32 %s1643_s19, 3  ;;  %s1679_s25 = smul.u32 48, %s2486_s21 }
  0x3b   :  { %860 = vmatprep.subr.bf16.mxu1 %v1792_v45  ;;  %v1886_v45 = vld [vmem:[%s2871_s2 + $0x2b0] ss:$24 sps:$4 sm:$0xff]   ;;  %s1646_s26 = sshll.u32 %s2469_s13, 3  ;;  %s2497_s1 = sld [smem:[#allocation4 + $0xa]] }
  0x3c   :  { %s1649_s28 = sshll.u32 %s2484_s20, 3  ;;  %s2515_s12 = sld [smem:[#allocation4 + $0xb]] }
  0x3d   :  { %748 = vmatpush1.bf16.msra.mxu0 %v1794_v46  ;;  %v1891_v46 = vld [vmem:[%s2871_s2 + $0x2e4] ss:$24 sps:$4 sm:$0xff]   ;;  %s2540_s8 = sld [smem:[#allocation4 + $0xc]]  ;;  %s1655_s29 = sshll.u32 %s2493_s24, 3 }
  0x3e   :  { %861 = vmatpush1.bf16.msra.mxu1 %v1795_v47  ;;  %749 = vmatprep.subr.bf16.mxu0 %v1796_v49  ;;  %v1889_v47 = vld [vmem:[%s2871_s2 + $0x2e0] ss:$24 sps:$4 sm:$0xff]   ;;  %s1680_s2 = smul.u32 48, %s2491_s0  ;;  %s2591_s11 = sld [smem:[#allocation4 + $0xe]] }
  0x3f   :  { %862 = vmatprep.subr.bf16.mxu1 %v1798_v50  ;;  %s1247_s20 = scalar_lea.vmem [#allocation2], %s1679_s25 }
  0x40   :  { %s1267_s19 = scalar_lea.vmem [#allocation2], %s1680_s2 }
  0x41   :  { %750 = vmatpush1.bf16.msra.mxu0 %v1800_v51  ;;  %s1658_s10 = sshll.u32 %s2497_s1, 3 }
  0x42   :  { %863 = vmatpush1.bf16.msra.mxu1 %v1801_v52  ;;  %751 = vmatprep.subr.bf16.mxu0 %v1802_v53  ;;  %v2333_v52 = vld [vmem:[%s2872_s3] sm:$0x3f]  ;;  %s2437_s3 = sld [smem:[#allocation4]]  ;;  %s1661_s7 = sshll.u32 %s2515_s12, 3 }
  0x43   :  { %864 = vmatprep.subr.bf16.mxu1 %v1804_v54  ;;  %s1664_s2 = sshll.u32 %s2540_s8, 3  ;;  %s2653_s16 = sshra.s32 %s1661_s7, 3 }
  0x45   :  { %752 = vmatpush1.bf16.msra.mxu0 %v1806_v55 }
  0x46   :  { %865 = vmatpush1.bf16.msra.mxu1 %v1807_v56  ;;  %753 = vmatprep.subr.bf16.mxu0 %v1808_v57 }
  0x47   :  { %866 = vmatprep.subr.bf16.mxu1 %v1810_v58 }
  0x48   :  { %s1628_s5 = sshll.u32 %s2437_s3, 3  ;;  %s2500_s3 = sshra.s32 %s1646_s26, 3 }
  0x49   :  { %754 = vmatpush1.bf16.msra.mxu0 %v1812_v59  ;;  %s2460_s9 = sshra.s32 %s1628_s5, 3  ;;  %s1227_s26 = scalar_lea.vmem [#allocation2], %s1678_s23 }
  0x4a   :  { %867 = vmatpush1.bf16.msra.mxu1 %v1813_v60  ;;  %755 = vmatprep.subr.bf16.mxu0 %v1814_v61  ;;  %s1675_s14 = smul.u32 48, %s2460_s9  ;;  %s1652_s9 = sshll.u32 %s2488_s22, 3 }
  0x4b   :  { %868 = vmatprep.subr.bf16.mxu1 %v1816_v62  ;;  %s1681_s22 = smul.u32 48, %s2500_s3  ;;  %s2589_s23 = sshra.s32 %s1655_s29, 3 }
  0x4c   :  { %s1167_s27 = scalar_lea.vmem [#allocation2], %s1675_s14  ;;  %s1684_s12 = smul.u32 48, %s2589_s23 }
  0x4d   :  { %756 = vmatpush1.bf16.msra.mxu0 %v1818_v63  ;;  %s1287_s14 = scalar_lea.vmem [#allocation2], %s1681_s22 }
  0x4e   :  { %869 = vmatpush1.bf16.msra.mxu1 %v1819_v0  ;;  %951 = vmatprep.subr.bf16.mxu0 %v1825_v1  ;;  %s1347_s30 = scalar_lea.vmem [#allocation2], %s1684_s12 }
  0x4f   :  { %1691 = vmatprep.subr.bf16.mxu1 %v1825_v1 }
  0x50   :  { %758 = vmatmul.mubr.bf16.vlgmr.msra.gmra.mrb[0].mxu0 %v2140_v2 }
  0x51   :  { %871 = vmatmul.mubr.bf16.vlgmr.msra.gmra.mrb[0].mxu1 %v2140_v2  ;;  %952 = vmatpush1.bf16.msra.mxu0 %v1823_v3 }
  0x52   :  { %1707 = vmatpush1.bf16.msra.mxu1 %v1823_v3  ;;  %953 = vmatprep.subr.bf16.mxu0 %v1828_v4 }
  0x53   :  { %1692 = vmatprep.subr.bf16.mxu1 %v1828_v4  ;;  %767 = vmatprep.mubr.bf16.mxu0 %v2151_v5 }
  0x54   :  { %880 = vmatprep.mubr.bf16.mxu1 %v2151_v5 }
  0x55   :  { %954 = vmatpush1.bf16.msra.mxu0 %v1826_v6 }
  0x56   :  { %1708 = vmatpush1.bf16.msra.mxu1 %v1826_v6  ;;  %955 = vmatprep.subr.bf16.mxu0 %v1834_v7 }
  0x57   :  { %1693 = vmatprep.subr.bf16.mxu1 %v1834_v7 }
  0x58   :  { %768 = vmatmul.mubr.bf16.gmra.mrb[4].mxu0 %v2166_v8 }
  0x59   :  { %881 = vmatmul.mubr.bf16.gmra.mrb[4].mxu1 %v2166_v8  ;;  %956 = vmatpush1.bf16.msra.mxu0 %v1832_v9 }
  0x5a   :  { %1709 = vmatpush1.bf16.msra.mxu1 %v1832_v9  ;;  %957 = vmatprep.subr.bf16.mxu0 %v1837_v10 }
  0x5b   :  { %1694 = vmatprep.subr.bf16.mxu1 %v1837_v10  ;;  %777 = vmatprep.mubr.bf16.mxu0 %v2177_v11 }
  0x5c   :  { %890 = vmatprep.mubr.bf16.mxu1 %v2177_v11 }
  0x5d   :  { %958 = vmatpush1.bf16.msra.mxu0 %v1835_v12 }
  0x5e   :  { %1710 = vmatpush1.bf16.msra.mxu1 %v1835_v12  ;;  %959 = vmatprep.subr.bf16.mxu0 %v1843_v13 }
  0x5f   :  { %1695 = vmatprep.subr.bf16.mxu1 %v1843_v13 }
  0x60   :  { %778 = vmatmul.mubr.bf16.gmra.mrb[8].mxu0 %v2192_v14 }
  0x61   :  { %891 = vmatmul.mubr.bf16.gmra.mrb[8].mxu1 %v2192_v14  ;;  %960 = vmatpush1.bf16.msra.mxu0 %v1841_v15 }
  0x62   :  { %1711 = vmatpush1.bf16.msra.mxu1 %v1841_v15  ;;  %961 = vmatprep.subr.bf16.mxu0 %v1846_v16 }
  0x63   :  { %1696 = vmatprep.subr.bf16.mxu1 %v1846_v16  ;;  %787 = vmatprep.mubr.bf16.mxu0 %v2203_v17 }
  0x64   :  { %900 = vmatprep.mubr.bf16.mxu1 %v2203_v17 }
  0x65   :  { %962 = vmatpush1.bf16.msra.mxu0 %v1844_v18 }
  0x66   :  { %1712 = vmatpush1.bf16.msra.mxu1 %v1844_v18  ;;  %963 = vmatprep.subr.bf16.mxu0 %v1852_v19 }
  0x67   :  { %1697 = vmatprep.subr.bf16.mxu1 %v1852_v19 }
  0x68   :  { %788 = vmatmul.mubr.bf16.gmra.mrb[12].mxu0 %v2218_v20 }
  0x69   :  { %901 = vmatmul.mubr.bf16.gmra.mrb[12].mxu1 %v2218_v20  ;;  %964 = vmatpush1.bf16.msra.mxu0 %v1850_v21 }
  0x6a   :  { %1713 = vmatpush1.bf16.msra.mxu1 %v1850_v21  ;;  %965 = vmatprep.subr.bf16.mxu0 %v1855_v22 }
  0x6b   :  { %1698 = vmatprep.subr.bf16.mxu1 %v1855_v22  ;;  %797 = vmatprep.mubr.bf16.mxu0 %v2229_v23 }
  0x6c   :  { %910 = vmatprep.mubr.bf16.mxu1 %v2229_v23 }
  0x6d   :  { %966 = vmatpush1.bf16.msra.mxu0 %v1853_v24 }
  0x6e   :  { %1714 = vmatpush1.bf16.msra.mxu1 %v1853_v24  ;;  %967 = vmatprep.subr.bf16.mxu0 %v1861_v25 }
  0x6f   :  { %1699 = vmatprep.subr.bf16.mxu1 %v1861_v25 }
  0x70   :  { %798 = vmatmul.mubr.bf16.gmra.mrb[16].mxu0 %v2244_v26 }
  0x71   :  { %911 = vmatmul.mubr.bf16.gmra.mrb[16].mxu1 %v2244_v26  ;;  %968 = vmatpush1.bf16.msra.mxu0 %v1859_v27 }
  0x72   :  { %1715 = vmatpush1.bf16.msra.mxu1 %v1859_v27  ;;  %969 = vmatprep.subr.bf16.mxu0 %v1864_v28 }
  0x73   :  { %1700 = vmatprep.subr.bf16.mxu1 %v1864_v28  ;;  %807 = vmatprep.mubr.bf16.mxu0 %v2255_v29 }
  0x74   :  { %920 = vmatprep.mubr.bf16.mxu1 %v2255_v29 }
  0x75   :  { %970 = vmatpush1.bf16.msra.mxu0 %v1862_v30 }
  0x76   :  { %1716 = vmatpush1.bf16.msra.mxu1 %v1862_v30  ;;  %971 = vmatprep.subr.bf16.mxu0 %v1870_v31 }
  0x77   :  { %1701 = vmatprep.subr.bf16.mxu1 %v1870_v31 }
  0x78   :  { %808 = vmatmul.mubr.bf16.gmra.mrb[20].mxu0 %v1867_v32 }
  0x79   :  { %921 = vmatmul.mubr.bf16.gmra.mrb[20].mxu1 %v1867_v32  ;;  %972 = vmatpush1.bf16.msra.mxu0 %v1868_v33 }
  0x7a   :  { %1717 = vmatpush1.bf16.msra.mxu1 %v1868_v33  ;;  %973 = vmatprep.subr.bf16.mxu0 %v1873_v34 }
  0x7b   :  { %1702 = vmatprep.subr.bf16.mxu1 %v1873_v34  ;;  %817 = vmatprep.mubr.bf16.mxu0 %v1874_v35 }
  0x7c   :  { %930 = vmatprep.mubr.bf16.mxu1 %v1874_v35 }
  0x7d   :  { %974 = vmatpush1.bf16.msra.mxu0 %v1871_v36 }
  0x7e   :  { %1718 = vmatpush1.bf16.msra.mxu1 %v1871_v36  ;;  %975 = vmatprep.subr.bf16.mxu0 %v1879_v37 }
  0x7f   :  { %1703 = vmatprep.subr.bf16.mxu1 %v1879_v37 }
  0x80   :  { %818 = vmatmul.mubr.bf16.gmra.mrb[24].mxu0 %v1876_v38 }
  0x81   :  { %931 = vmatmul.mubr.bf16.gmra.mrb[24].mxu1 %v1876_v38  ;;  %976 = vmatpush1.bf16.msra.mxu0 %v1877_v39 }
  0x82   :  { %1719 = vmatpush1.bf16.msra.mxu1 %v1877_v39  ;;  %977 = vmatprep.subr.bf16.mxu0 %v1882_v40 }
  0x83   :  { %1704 = vmatprep.subr.bf16.mxu1 %v1882_v40  ;;  %827 = vmatprep.mubr.bf16.mxu0 %v1883_v41 }
  0x84   :  { %940 = vmatprep.mubr.bf16.mxu1 %v1883_v41 }
  0x85   :  { %978 = vmatpush1.bf16.msra.mxu0 %v1880_v42 }
  0x86   :  { %1720 = vmatpush1.bf16.msra.mxu1 %v1880_v42  ;;  %979 = vmatprep.subr.bf16.mxu0 %v1888_v43 }
  0x87   :  { %1705 = vmatprep.subr.bf16.mxu1 %v1888_v43 }
  0x88   :  { %828 = vmatmul.mubr.bf16.gmra.mrb[28].mxu0 %v1885_v44 }
  0x89   :  { %941 = vmatmul.mubr.bf16.gmra.mrb[28].mxu1 %v1885_v44  ;;  %980 = vmatpush1.bf16.msra.mxu0 %v1886_v45 }
  0x8a   :  { %1721 = vmatpush1.bf16.msra.mxu1 %v1886_v45  ;;  %981 = vmatprep.subr.bf16.mxu0 %v1891_v46 }
  0x8b   :  { %1706 = vmatprep.subr.bf16.mxu1 %v1891_v46  ;;  %983 = vmatprep.mubr.bf16.mxu0 %v2082_v48  ;;  %v135_v48 = vlaneseq }
  0x8c   :  { %1023 = vmatprep.mubr.bf16.mxu1 %v2229_v23 }
  0x8d   :  { %982 = vmatpush1.bf16.msra.mxu0 %v1889_v47  ;;  %v2326_v49 = vshrl.u32 %v135_v48, 7 }
  0x8e   :  { %1722 = vmatpush1.bf16.msra.mxu1 %v1889_v47 }
  0x8f   :  { %v137_v50 = vsub.s32 0, %v2326_v49  ;;  %v145_v51 = vsub.s32 2, %v2326_v49  ;;  %v141_v53 = vsub.s32 1, %v2326_v49  ;;  %v149_v54 = vsub.s32 3, %v2326_v49 }
  0x90   :  { %984 = vmatmul.mubr.bf16.vlgmr.msra.gmra.mrb[32].mxu0 %v2140_v2 }
  0x91   :  { %1024 = vmatmul.mubr.bf16.vlgmr.msra.gmra.mrb[32].mxu1 %v2244_v26  ;;  %993 = vmatprep.mubr.bf16.mxu0 %v2151_v5  ;;  %v2338_v55 = vrot.slane %v2333_v52, %v137_v50  ;;  %v2341_v56 = vrot.slane %v2333_v52, %v145_v51  ;;  %v2344_v57 = vrot.slane %v2333_v52, %v141_v53 }
  0x92   :  { %1033 = vmatprep.mubr.bf16.mxu1 %v2255_v29  ;;  %v2347_v58 = vrot.slane %v2333_v52, %v149_v54 }
  0x98   :  { %994 = vmatmul.mubr.bf16.gmra.mrb[36].mxu0 %v2166_v8 }
  0x99   :  { %1034 = vmatmul.mubr.bf16.gmra.mrb[36].mxu1 %v1867_v32  ;;  %1003 = vmatprep.mubr.bf16.mxu0 %v2177_v11 }
  0x9a   :  { %1043 = vmatprep.mubr.bf16.mxu1 %v1874_v35 }
  0xa0   :  { %1004 = vmatmul.mubr.bf16.gmra.mrb[40].mxu0 %v2192_v14 }
  0xa1   :  { %1044 = vmatmul.mubr.bf16.gmra.mrb[40].mxu1 %v1876_v38  ;;  %1013 = vmatprep.mubr.bf16.mxu0 %v2203_v17 }
  0xa2   :  { %1053 = vmatprep.mubr.bf16.mxu1 %v1883_v41 }
  0xa8   :  { %1014 = vmatmul.mubr.bf16.gmra.mrb[44].mxu0 %v2218_v20 }
  0xa9   :  { %1054 = vmatmul.mubr.bf16.gmra.mrb[44].mxu1 %v1885_v44 }
 0x123   :  { %v759_v59 = vpop.f32.mrb[0].mxu0 }
 0x124   :  { %v872_v60 = vpop.f32.mrb[0].mxu1  ;;  %v760_v61 = vadd.f32 %v759_v59, %v2338_v55  ;;  %v761_v63 = vpop.f32.mrb[1].mxu0 }
 0x125   :  { %v873_v62 = vadd.f32 %v872_v60, %v2341_v56  ;;  %v874_v0 = vpop.f32.mrb[1].mxu1  ;;  %v762_v1 = vadd.f32 %v761_v63, %v2344_v57  ;;  %v763_v3 = vpop.f32.mrb[2].mxu0 }
 0x126   :  { %v875_v2 = vadd.f32 %v874_v0, %v2347_v58  ;;  %v876_v4 = vpop.f32.mrb[2].mxu1  ;;  %1064 = vst [vmem:[#allocation2] sm:$0xff] %v760_v61  ;;  %v764_v5 = vadd.f32 %v763_v3, %v2338_v55  ;;  %v765_v7 = vpop.f32.mrb[3].mxu0 }
 0x127   :  { %1066 = vst [vmem:[#allocation2 + $0x10] sm:$0xff] %v873_v62  ;;  %v877_v6 = vadd.f32 %v876_v4, %v2341_v56  ;;  %v878_v8 = vpop.f32.mrb[3].mxu1  ;;  %1065 = vst [vmem:[#allocation2 + $0x8] sm:$0xff] %v762_v1  ;;  %v766_v9 = vadd.f32 %v765_v7, %v2344_v57 }
 0x128   :  { %1067 = vst [vmem:[#allocation2 + $0x18] sm:$0xff] %v875_v2  ;;  %v879_v10 = vadd.f32 %v878_v8, %v2347_v58  ;;  %1070 = vst [vmem:[#allocation2 + $0x30] sm:$0xff] %v764_v5 }
 0x129   :  { %1072 = vst [vmem:[#allocation2 + $0x40] sm:$0xff] %v877_v6  ;;  %1071 = vst [vmem:[#allocation2 + $0x38] sm:$0xff] %v766_v9 }
 0x12a   :  { %1073 = vst [vmem:[#allocation2 + $0x48] sm:$0xff] %v879_v10 }
 0x12b   :  { %v769_v11 = vpop.f32.mrb[4].mxu0 }
 0x12c   :  { %v882_v12 = vpop.f32.mrb[4].mxu1  ;;  %v770_v13 = vadd.f32 %v769_v11, %v2338_v55  ;;  %v771_v15 = vpop.f32.mrb[5].mxu0 }
 0x12d   :  { %v883_v14 = vadd.f32 %v882_v12, %v2341_v56  ;;  %v884_v16 = vpop.f32.mrb[5].mxu1  ;;  %v772_v17 = vadd.f32 %v771_v15, %v2344_v57  ;;  %v773_v19 = vpop.f32.mrb[6].mxu0 }
 0x12e   :  { %v885_v18 = vadd.f32 %v884_v16, %v2347_v58  ;;  %v886_v20 = vpop.f32.mrb[6].mxu1  ;;  %1076 = vst [vmem:[#allocation2 + $0x60] sm:$0xff] %v770_v13  ;;  %v774_v21 = vadd.f32 %v773_v19, %v2338_v55  ;;  %v775_v23 = vpop.f32.mrb[7].mxu0 }
 0x12f   :  { %1078 = vst [vmem:[#allocation2 + $0x70] sm:$0xff] %v883_v14  ;;  %v887_v22 = vadd.f32 %v886_v20, %v2341_v56  ;;  %v888_v24 = vpop.f32.mrb[7].mxu1  ;;  %1077 = vst [vmem:[#allocation2 + $0x68] sm:$0xff] %v772_v17  ;;  %v776_v25 = vadd.f32 %v775_v23, %v2344_v57 }
 0x130   :  { %1079 = vst [vmem:[#allocation2 + $0x78] sm:$0xff] %v885_v18  ;;  %v889_v26 = vadd.f32 %v888_v24, %v2347_v58  ;;  %1082 = vst [vmem:[#allocation2 + $0x90] sm:$0xff] %v774_v21 }
 0x131   :  { %1084 = vst [vmem:[#allocation2 + $0xa0] sm:$0xff] %v887_v22  ;;  %1083 = vst [vmem:[#allocation2 + $0x98] sm:$0xff] %v776_v25 }
 0x132   :  { %1085 = vst [vmem:[#allocation2 + $0xa8] sm:$0xff] %v889_v26 }
 0x133   :  { %v779_v27 = vpop.f32.mrb[8].mxu0 }
 0x134   :  { %v892_v28 = vpop.f32.mrb[8].mxu1  ;;  %v780_v29 = vadd.f32 %v779_v27, %v2338_v55  ;;  %v781_v31 = vpop.f32.mrb[9].mxu0 }
 0x135   :  { %v893_v30 = vadd.f32 %v892_v28, %v2341_v56  ;;  %v894_v32 = vpop.f32.mrb[9].mxu1  ;;  %v782_v33 = vadd.f32 %v781_v31, %v2344_v57  ;;  %v783_v35 = vpop.f32.mrb[10].mxu0 }
 0x136   :  { %v895_v34 = vadd.f32 %v894_v32, %v2347_v58  ;;  %v896_v36 = vpop.f32.mrb[10].mxu1  ;;  %1088 = vst [vmem:[#allocation2 + $0xc0] sm:$0xff] %v780_v29  ;;  %v784_v37 = vadd.f32 %v783_v35, %v2338_v55  ;;  %v785_v39 = vpop.f32.mrb[11].mxu0 }
 0x137   :  { %1090 = vst [vmem:[#allocation2 + $0xd0] sm:$0xff] %v893_v30  ;;  %v897_v38 = vadd.f32 %v896_v36, %v2341_v56  ;;  %v898_v40 = vpop.f32.mrb[11].mxu1  ;;  %1089 = vst [vmem:[#allocation2 + $0xc8] sm:$0xff] %v782_v33  ;;  %v786_v41 = vadd.f32 %v785_v39, %v2344_v57 }
 0x138   :  { %1091 = vst [vmem:[#allocation2 + $0xd8] sm:$0xff] %v895_v34  ;;  %v899_v42 = vadd.f32 %v898_v40, %v2347_v58  ;;  %1094 = vst [vmem:[#allocation2 + $0xf0] sm:$0xff] %v784_v37 }
 0x139   :  { %1096 = vst [vmem:[#allocation2 + $0x100] sm:$0xff] %v897_v38  ;;  %1095 = vst [vmem:[#allocation2 + $0xf8] sm:$0xff] %v786_v41 }
 0x13a   :  { %1097 = vst [vmem:[#allocation2 + $0x108] sm:$0xff] %v899_v42 }
 0x13b   :  { %v789_v43 = vpop.f32.mrb[12].mxu0 }
 0x13c   :  { %v902_v44 = vpop.f32.mrb[12].mxu1  ;;  %v790_v45 = vadd.f32 %v789_v43, %v2338_v55  ;;  %v791_v47 = vpop.f32.mrb[13].mxu0 }
 0x13d   :  { %v903_v46 = vadd.f32 %v902_v44, %v2341_v56  ;;  %v904_v48 = vpop.f32.mrb[13].mxu1  ;;  %v792_v50 = vadd.f32 %v791_v47, %v2344_v57  ;;  %v793_v53 = vpop.f32.mrb[14].mxu0 }
 0x13e   :  { %v905_v51 = vadd.f32 %v904_v48, %v2347_v58  ;;  %v906_v54 = vpop.f32.mrb[14].mxu1  ;;  %1100 = vst [vmem:[#allocation2 + $0x120] sm:$0xff] %v790_v45  ;;  %v794_v59 = vadd.f32 %v793_v53, %v2338_v55  ;;  %v795_v61 = vpop.f32.mrb[15].mxu0 }
 0x13f   :  { %1102 = vst [vmem:[#allocation2 + $0x130] sm:$0xff] %v903_v46  ;;  %v907_v60 = vadd.f32 %v906_v54, %v2341_v56  ;;  %v908_v62 = vpop.f32.mrb[15].mxu1  ;;  %1101 = vst [vmem:[#allocation2 + $0x128] sm:$0xff] %v792_v50  ;;  %v796_v63 = vadd.f32 %v795_v61, %v2344_v57  ;;  %v153_v61 = vsub.s32 4, %v2326_v49 }
 0x140   :  { %1103 = vst [vmem:[#allocation2 + $0x138] sm:$0xff] %v905_v51  ;;  %v909_v0 = vadd.f32 %v908_v62, %v2347_v58  ;;  %1106 = vst [vmem:[#allocation2 + $0x150] sm:$0xff] %v794_v59 }
 0x141   :  { %1108 = vst [vmem:[#allocation2 + $0x160] sm:$0xff] %v907_v60  ;;  %1107 = vst [vmem:[#allocation2 + $0x158] sm:$0xff] %v796_v63 }
 0x142   :  { %1109 = vst [vmem:[#allocation2 + $0x168] sm:$0xff] %v909_v0 }
 0x143   :  { %v799_v1 = vpop.f32.mrb[16].mxu0 }
 0x144   :  { %v912_v2 = vpop.f32.mrb[16].mxu1  ;;  %v800_v3 = vadd.f32 %v799_v1, %v2338_v55  ;;  %v801_v5 = vpop.f32.mrb[17].mxu0 }
 0x145   :  { %v913_v4 = vadd.f32 %v912_v2, %v2341_v56  ;;  %v914_v6 = vpop.f32.mrb[17].mxu1  ;;  %v802_v7 = vadd.f32 %v801_v5, %v2344_v57  ;;  %v803_v9 = vpop.f32.mrb[18].mxu0  ;;  %v157_v2 = vsub.s32 5, %v2326_v49 }
 0x146   :  { %v915_v8 = vadd.f32 %v914_v6, %v2347_v58  ;;  %v916_v10 = vpop.f32.mrb[18].mxu1  ;;  %1112 = vst [vmem:[#allocation2 + $0x180] sm:$0xff] %v800_v3  ;;  %v804_v11 = vadd.f32 %v803_v9, %v2338_v55  ;;  %v805_v13 = vpop.f32.mrb[19].mxu0  ;;  %v2416_v9 = vrot.slane %v2333_v52, %v153_v61 }
 0x147   :  { %1114 = vst [vmem:[#allocation2 + $0x190] sm:$0xff] %v913_v4  ;;  %v917_v12 = vadd.f32 %v916_v10, %v2341_v56  ;;  %v918_v14 = vpop.f32.mrb[19].mxu1  ;;  %1113 = vst [vmem:[#allocation2 + $0x188] sm:$0xff] %v802_v7  ;;  %v806_v15 = vadd.f32 %v805_v13, %v2344_v57  ;;  %v2419_v49 = vrot.slane %v2333_v52, %v157_v2 }
 0x148   :  { %1115 = vst [vmem:[#allocation2 + $0x198] sm:$0xff] %v915_v8  ;;  %v919_v16 = vadd.f32 %v918_v14, %v2347_v58  ;;  %1118 = vst [vmem:[#allocation2 + $0x1b0] sm:$0xff] %v804_v11 }
 0x149   :  { %1120 = vst [vmem:[#allocation2 + $0x1c0] sm:$0xff] %v917_v12  ;;  %1119 = vst [vmem:[#allocation2 + $0x1b8] sm:$0xff] %v806_v15 }
 0x14a   :  { %1121 = vst [vmem:[#allocation2 + $0x1c8] sm:$0xff] %v919_v16 }
 0x14b   :  { %v809_v17 = vpop.f32.mrb[20].mxu0 }
 0x14c   :  { %v922_v18 = vpop.f32.mrb[20].mxu1  ;;  %v810_v19 = vadd.f32 %v809_v17, %v2338_v55  ;;  %v811_v21 = vpop.f32.mrb[21].mxu0 }
 0x14d   :  { %v923_v20 = vadd.f32 %v922_v18, %v2341_v56  ;;  %v924_v22 = vpop.f32.mrb[21].mxu1  ;;  %v812_v23 = vadd.f32 %v811_v21, %v2344_v57  ;;  %v813_v25 = vpop.f32.mrb[22].mxu0 }
 0x14e   :  { %v925_v24 = vadd.f32 %v924_v22, %v2347_v58  ;;  %v926_v26 = vpop.f32.mrb[22].mxu1  ;;  %1124 = vst [vmem:[#allocation2 + $0x1e0] sm:$0xff] %v810_v19  ;;  %v814_v27 = vadd.f32 %v813_v25, %v2338_v55  ;;  %v815_v29 = vpop.f32.mrb[23].mxu0 }
 0x14f   :  { %1126 = vst [vmem:[#allocation2 + $0x1f0] sm:$0xff] %v923_v20  ;;  %v927_v28 = vadd.f32 %v926_v26, %v2341_v56  ;;  %v928_v30 = vpop.f32.mrb[23].mxu1  ;;  %1125 = vst [vmem:[#allocation2 + $0x1e8] sm:$0xff] %v812_v23  ;;  %v816_v31 = vadd.f32 %v815_v29, %v2344_v57 }
 0x150   :  { %1127 = vst [vmem:[#allocation2 + $0x1f8] sm:$0xff] %v925_v24  ;;  %v929_v32 = vadd.f32 %v928_v30, %v2347_v58  ;;  %1130 = vst [vmem:[#allocation2 + $0x210] sm:$0xff] %v814_v27 }
 0x151   :  { %1132 = vst [vmem:[#allocation2 + $0x220] sm:$0xff] %v927_v28  ;;  %1131 = vst [vmem:[#allocation2 + $0x218] sm:$0xff] %v816_v31 }
 0x152   :  { %1133 = vst [vmem:[#allocation2 + $0x228] sm:$0xff] %v929_v32 }
 0x153   :  { %v819_v33 = vpop.f32.mrb[24].mxu0 }
 0x154   :  { %v932_v34 = vpop.f32.mrb[24].mxu1  ;;  %v820_v35 = vadd.f32 %v819_v33, %v2338_v55  ;;  %v821_v37 = vpop.f32.mrb[25].mxu0 }
 0x155   :  { %v933_v36 = vadd.f32 %v932_v34, %v2341_v56  ;;  %v934_v38 = vpop.f32.mrb[25].mxu1  ;;  %v822_v39 = vadd.f32 %v821_v37, %v2344_v57  ;;  %v823_v41 = vpop.f32.mrb[26].mxu0 }
 0x156   :  { %v935_v40 = vadd.f32 %v934_v38, %v2347_v58  ;;  %v936_v42 = vpop.f32.mrb[26].mxu1  ;;  %1136 = vst [vmem:[#allocation2 + $0x240] sm:$0xff] %v820_v35  ;;  %v824_v43 = vadd.f32 %v823_v41, %v2338_v55  ;;  %v825_v45 = vpop.f32.mrb[27].mxu0 }
 0x157   :  { %1138 = vst [vmem:[#allocation2 + $0x250] sm:$0xff] %v933_v36  ;;  %v937_v44 = vadd.f32 %v936_v42, %v2341_v56  ;;  %v938_v46 = vpop.f32.mrb[27].mxu1  ;;  %1137 = vst [vmem:[#allocation2 + $0x248] sm:$0xff] %v822_v39  ;;  %v826_v47 = vadd.f32 %v825_v45, %v2344_v57 }
 0x158   :  { %1139 = vst [vmem:[#allocation2 + $0x258] sm:$0xff] %v935_v40  ;;  %v939_v48 = vadd.f32 %v938_v46, %v2347_v58  ;;  %1142 = vst [vmem:[#allocation2 + $0x270] sm:$0xff] %v824_v43 }
 0x159   :  { %1144 = vst [vmem:[#allocation2 + $0x280] sm:$0xff] %v937_v44  ;;  %1143 = vst [vmem:[#allocation2 + $0x278] sm:$0xff] %v826_v47 }
 0x15a   :  { %1145 = vst [vmem:[#allocation2 + $0x288] sm:$0xff] %v939_v48 }
 0x15b   :  { %v829_v50 = vpop.f32.mrb[28].mxu0 }
 0x15c   :  { %v942_v51 = vpop.f32.mrb[28].mxu1  ;;  %v830_v53 = vadd.f32 %v829_v50, %v2338_v55  ;;  %v831_v59 = vpop.f32.mrb[29].mxu0 }
 0x15d   :  { %v943_v54 = vadd.f32 %v942_v51, %v2341_v56  ;;  %v944_v60 = vpop.f32.mrb[29].mxu1  ;;  %v832_v62 = vadd.f32 %v831_v59, %v2344_v57  ;;  %v833_v0 = vpop.f32.mrb[30].mxu0 }
 0x15e   :  { %v945_v63 = vadd.f32 %v944_v60, %v2347_v58  ;;  %v946_v1 = vpop.f32.mrb[30].mxu1  ;;  %1148 = vst [vmem:[#allocation2 + $0x2a0] sm:$0xff] %v830_v53  ;;  %v834_v3 = vadd.f32 %v833_v0, %v2338_v55  ;;  %v835_v5 = vpop.f32.mrb[31].mxu0 }
 0x15f   :  { %1150 = vst [vmem:[#allocation2 + $0x2b0] sm:$0xff] %v943_v54  ;;  %v947_v4 = vadd.f32 %v946_v1, %v2341_v56  ;;  %v948_v6 = vpop.f32.mrb[31].mxu1  ;;  %1149 = vst [vmem:[#allocation2 + $0x2a8] sm:$0xff] %v832_v62  ;;  %v836_v7 = vadd.f32 %v835_v5, %v2344_v57 }
 0x160   :  { %1151 = vst [vmem:[#allocation2 + $0x2b8] sm:$0xff] %v945_v63  ;;  %v949_v8 = vadd.f32 %v948_v6, %v2347_v58  ;;  %1154 = vst [vmem:[#allocation2 + $0x2d0] sm:$0xff] %v834_v3 }
 0x161   :  { %1156 = vst [vmem:[#allocation2 + $0x2e0] sm:$0xff] %v947_v4  ;;  %1155 = vst [vmem:[#allocation2 + $0x2d8] sm:$0xff] %v836_v7 }
 0x162   :  { %1157 = vst [vmem:[#allocation2 + $0x2e8] sm:$0xff] %v949_v8 }
 0x163   :  { %v985_v55 = vpop.f32.mrb[32].mxu0 }
 0x164   :  { %v1025_v56 = vpop.f32.mrb[32].mxu1  ;;  %v986_v10 = vadd.f32 %v985_v55, %v2416_v9  ;;  %v987_v12 = vpop.f32.mrb[33].mxu0 }
 0x165   :  { %v1026_v11 = vadd.f32 %v1025_v56, %v2416_v9  ;;  %v1027_v57 = vpop.f32.mrb[33].mxu1  ;;  %v988_v58 = vadd.f32 %v987_v12, %v2419_v49  ;;  %v989_v14 = vpop.f32.mrb[34].mxu0 }
 0x166   :  { %v1028_v13 = vadd.f32 %v1027_v57, %v2419_v49  ;;  %v1029_v15 = vpop.f32.mrb[34].mxu1  ;;  %1068 = vst [vmem:[#allocation2 + $0x20] sm:$0xff] %v986_v10  ;;  %v990_v16 = vadd.f32 %v989_v14, %v2416_v9  ;;  %v991_v17 = vpop.f32.mrb[35].mxu0 }
 0x167   :  { %1116 = vst [vmem:[#allocation2 + $0x1a0] sm:$0xff] %v1026_v11  ;;  %v1030_v52 = vadd.f32 %v1029_v15, %v2416_v9  ;;  %v1031_v18 = vpop.f32.mrb[35].mxu1  ;;  %1069 = vst [vmem:[#allocation2 + $0x28] sm:$0xff] %v988_v58  ;;  %v992_v19 = vadd.f32 %v991_v17, %v2419_v49 }
 0x168   :  { %1117 = vst [vmem:[#allocation2 + $0x1a8] sm:$0xff] %v1028_v13  ;;  %v1032_v20 = vadd.f32 %v1031_v18, %v2419_v49  ;;  %1074 = vst [vmem:[#allocation2 + $0x50] sm:$0xff] %v990_v16 }
 0x169   :  { %1122 = vst [vmem:[#allocation2 + $0x1d0] sm:$0xff] %v1030_v52  ;;  %1075 = vst [vmem:[#allocation2 + $0x58] sm:$0xff] %v992_v19 }
 0x16a   :  { %1123 = vst [vmem:[#allocation2 + $0x1d8] sm:$0xff] %v1032_v20 }
 0x16b   :  { %v995_v21 = vpop.f32.mrb[36].mxu0 }
 0x16c   :  { %v1035_v22 = vpop.f32.mrb[36].mxu1  ;;  %v996_v23 = vadd.f32 %v995_v21, %v2416_v9  ;;  %v997_v25 = vpop.f32.mrb[37].mxu0 }
 0x16d   :  { %v1036_v24 = vadd.f32 %v1035_v22, %v2416_v9  ;;  %v1037_v26 = vpop.f32.mrb[37].mxu1  ;;  %v998_v27 = vadd.f32 %v997_v25, %v2419_v49  ;;  %v999_v29 = vpop.f32.mrb[38].mxu0 }
 0x16e   :  { %v1038_v28 = vadd.f32 %v1037_v26, %v2419_v49  ;;  %v1039_v30 = vpop.f32.mrb[38].mxu1  ;;  %1080 = vst [vmem:[#allocation2 + $0x80] sm:$0xff] %v996_v23  ;;  %v1000_v31 = vadd.f32 %v999_v29, %v2416_v9  ;;  %v1001_v33 = vpop.f32.mrb[39].mxu0 }
 0x16f   :  { %1128 = vst [vmem:[#allocation2 + $0x200] sm:$0xff] %v1036_v24  ;;  %v1040_v32 = vadd.f32 %v1039_v30, %v2416_v9  ;;  %v1041_v34 = vpop.f32.mrb[39].mxu1  ;;  %1081 = vst [vmem:[#allocation2 + $0x88] sm:$0xff] %v998_v27  ;;  %v1002_v35 = vadd.f32 %v1001_v33, %v2419_v49 }
 0x170   :  { %1129 = vst [vmem:[#allocation2 + $0x208] sm:$0xff] %v1038_v28  ;;  %v1042_v36 = vadd.f32 %v1041_v34, %v2419_v49  ;;  %1086 = vst [vmem:[#allocation2 + $0xb0] sm:$0xff] %v1000_v31 }
 0x171   :  { %1134 = vst [vmem:[#allocation2 + $0x230] sm:$0xff] %v1040_v32  ;;  %1087 = vst [vmem:[#allocation2 + $0xb8] sm:$0xff] %v1002_v35 }
 0x172   :  { %1135 = vst [vmem:[#allocation2 + $0x238] sm:$0xff] %v1042_v36 }
 0x173   :  { %v1005_v37 = vpop.f32.mrb[40].mxu0 }
 0x174   :  { %v1045_v38 = vpop.f32.mrb[40].mxu1  ;;  %v1006_v39 = vadd.f32 %v1005_v37, %v2416_v9  ;;  %v1007_v41 = vpop.f32.mrb[41].mxu0 }
 0x175   :  { %v1046_v40 = vadd.f32 %v1045_v38, %v2416_v9  ;;  %v1047_v42 = vpop.f32.mrb[41].mxu1  ;;  %v1008_v43 = vadd.f32 %v1007_v41, %v2419_v49  ;;  %v1009_v45 = vpop.f32.mrb[42].mxu0 }
 0x176   :  { %v1048_v44 = vadd.f32 %v1047_v42, %v2419_v49  ;;  %v1049_v46 = vpop.f32.mrb[42].mxu1  ;;  %1092 = vst [vmem:[#allocation2 + $0xe0] sm:$0xff] %v1006_v39  ;;  %v1010_v47 = vadd.f32 %v1009_v45, %v2416_v9  ;;  %v1011_v50 = vpop.f32.mrb[43].mxu0 }
 0x177   :  { %1140 = vst [vmem:[#allocation2 + $0x260] sm:$0xff] %v1046_v40  ;;  %v1050_v48 = vadd.f32 %v1049_v46, %v2416_v9  ;;  %v1051_v51 = vpop.f32.mrb[43].mxu1  ;;  %1093 = vst [vmem:[#allocation2 + $0xe8] sm:$0xff] %v1008_v43  ;;  %v1012_v53 = vadd.f32 %v1011_v50, %v2419_v49 }
 0x178   :  { %1141 = vst [vmem:[#allocation2 + $0x268] sm:$0xff] %v1048_v44  ;;  %v1052_v54 = vadd.f32 %v1051_v51, %v2419_v49  ;;  %1098 = vst [vmem:[#allocation2 + $0x110] sm:$0xff] %v1010_v47 }
 0x179   :  { %1146 = vst [vmem:[#allocation2 + $0x290] sm:$0xff] %v1050_v48  ;;  %1099 = vst [vmem:[#allocation2 + $0x118] sm:$0xff] %v1012_v53 }
 0x17a   :  { %1147 = vst [vmem:[#allocation2 + $0x298] sm:$0xff] %v1052_v54 }
 0x17b   :  { %v1015_v59 = vpop.f32.mrb[44].mxu0 }
 0x17c   :  { %v1055_v60 = vpop.f32.mrb[44].mxu1  ;;  %v1016_v61 = vadd.f32 %v1015_v59, %v2416_v9  ;;  %v1017_v63 = vpop.f32.mrb[45].mxu0 }
 0x17d   :  { %v1056_v62 = vadd.f32 %v1055_v60, %v2416_v9  ;;  %v1057_v0 = vpop.f32.mrb[45].mxu1  ;;  %v1018_v1 = vadd.f32 %v1017_v63, %v2419_v49  ;;  %v1019_v3 = vpop.f32.mrb[46].mxu0 }
 0x17e   :  { %v1058_v2 = vadd.f32 %v1057_v0, %v2419_v49  ;;  %v1059_v4 = vpop.f32.mrb[46].mxu1  ;;  %1104 = vst [vmem:[#allocation2 + $0x140] sm:$0xff] %v1016_v61  ;;  %v1020_v5 = vadd.f32 %v1019_v3, %v2416_v9  ;;  %v1021_v7 = vpop.f32.mrb[47].mxu0 }
 0x17f   :  { %1152 = vst [vmem:[#allocation2 + $0x2c0] sm:$0xff] %v1056_v62  ;;  %v1060_v6 = vadd.f32 %v1059_v4, %v2416_v9  ;;  %v1061_v8 = vpop.f32.mrb[47].mxu1  ;;  %1105 = vst [vmem:[#allocation2 + $0x148] sm:$0xff] %v1018_v1  ;;  %v1022_v55 = vadd.f32 %v1021_v7, %v2419_v49 }
 0x180   :  { %1153 = vst [vmem:[#allocation2 + $0x2c8] sm:$0xff] %v1058_v2  ;;  %v1062_v56 = vadd.f32 %v1061_v8, %v2419_v49  ;;  %1110 = vst [vmem:[#allocation2 + $0x170] sm:$0xff] %v1020_v5 }
 0x181   :  { %1158 = vst [vmem:[#allocation2 + $0x2f0] sm:$0xff] %v1060_v6  ;;  %1111 = vst [vmem:[#allocation2 + $0x178] sm:$0xff] %v1022_v55 }
 0x182   :  { %1159 = vst [vmem:[#allocation2 + $0x2f8] sm:$0xff] %v1062_v56 }
 0x189   :  { %v1168_v9 = vld [vmem:[%s1167_s27] sm:$0xff]  ;;  %v1169_v49 = vld [vmem:[%s1167_s27 + $0x8] sm:$0xff]  ;;  %v1170_v10 = vld [vmem:[%s1167_s27 + $0x10] sm:$0xff] }
 0x18a   :  { %v1171_v11 = vld [vmem:[%s1167_s27 + $0x18] sm:$0xff]  ;;  %v1172_v12 = vld [vmem:[%s1167_s27 + $0x20] sm:$0xff]  ;;  %v1173_v57 = vld [vmem:[%s1167_s27 + $0x28] sm:$0xff]  ;;  %1174 = vst [vmem:[%s2873_s4] sm:$0xff] %v1168_v9  ;;  %s1187_s27 = scalar_lea.vmem [#allocation2], %s1676_s15  ;;  %s2538_s15 = sshra.s32 %s1649_s28, 3 }
 0x18b   :  { %1175 = vst [vmem:[%s2873_s4 + $0x8] sm:$0xff] %v1169_v49  ;;  %1176 = vst [vmem:[%s2873_s4 + $0x10] sm:$0xff] %v1170_v10  ;;  %v1188_v58 = vld [vmem:[%s1187_s27] sm:$0xff]  ;;  %v1189_v13 = vld [vmem:[%s1187_s27 + $0x8] sm:$0xff]  ;;  %s2553_s28 = sshra.s32 %s1652_s9, 3  ;;  %s2566_s9 = sld [smem:[#allocation4 + $0xd]] }
 0x18c   :  { %1177 = vst [vmem:[%s2873_s4 + $0x18] sm:$0xff] %v1171_v11  ;;  %1178 = vst [vmem:[%s2873_s4 + $0x20] sm:$0xff] %v1172_v12  ;;  %v1190_v14 = vld [vmem:[%s1187_s27 + $0x10] sm:$0xff]  ;;  %v1191_v15 = vld [vmem:[%s1187_s27 + $0x18] sm:$0xff]  ;;  %s1682_s1 = smul.u32 48, %s2538_s15 }
 0x18d   :  { %1179 = vst [vmem:[%s2873_s4 + $0x28] sm:$0xff] %v1173_v57  ;;  %v1192_v16 = vld [vmem:[%s1187_s27 + $0x20] sm:$0xff]  ;;  %v1193_v52 = vld [vmem:[%s1187_s27 + $0x28] sm:$0xff]  ;;  %1194 = vst [vmem:[%s2873_s4 + $0x30] sm:$0xff] %v1188_v58  ;;  %s1207_s27 = scalar_lea.vmem [#allocation2], %s1677_s17  ;;  %s1683_s29 = smul.u32 48, %s2553_s28 }
 0x18e   :  { %1195 = vst [vmem:[%s2873_s4 + $0x38] sm:$0xff] %v1189_v13  ;;  %1196 = vst [vmem:[%s2873_s4 + $0x40] sm:$0xff] %v1190_v14  ;;  %v1208_v17 = vld [vmem:[%s1207_s27] sm:$0xff]  ;;  %v1209_v18 = vld [vmem:[%s1207_s27 + $0x8] sm:$0xff]  ;;  %s1307_s17 = scalar_lea.vmem [#allocation2], %s1682_s1  ;;  %s1686_s1 = smul.u32 48, %s2653_s16 }
 0x18f   :  { %1197 = vst [vmem:[%s2873_s4 + $0x48] sm:$0xff] %v1191_v15  ;;  %1198 = vst [vmem:[%s2873_s4 + $0x50] sm:$0xff] %v1192_v16  ;;  %v1210_v19 = vld [vmem:[%s1207_s27 + $0x10] sm:$0xff]  ;;  %v1211_v20 = vld [vmem:[%s1207_s27 + $0x18] sm:$0xff]  ;;  %s1327_s0 = scalar_lea.vmem [#allocation2], %s1683_s29 }
 0x190   :  { %1199 = vst [vmem:[%s2873_s4 + $0x58] sm:$0xff] %v1193_v52  ;;  %v1212_v21 = vld [vmem:[%s1207_s27 + $0x20] sm:$0xff]  ;;  %v1213_v22 = vld [vmem:[%s1207_s27 + $0x28] sm:$0xff]  ;;  %1214 = vst [vmem:[%s2873_s4 + $0x60] sm:$0xff] %v1208_v17  ;;  %s1670_s27 = sshll.u32 %s2591_s11, 3 }
 0x191   :  { %1215 = vst [vmem:[%s2873_s4 + $0x68] sm:$0xff] %v1209_v18  ;;  %1216 = vst [vmem:[%s2873_s4 + $0x70] sm:$0xff] %v1210_v19  ;;  %v1228_v23 = vld [vmem:[%s1227_s26] sm:$0xff]  ;;  %v1229_v24 = vld [vmem:[%s1227_s26 + $0x8] sm:$0xff]  ;;  %s1667_s5 = sshll.u32 %s2566_s9, 3  ;;  %s2676_s9 = sshra.s32 %s1664_s2, 3 }
 0x192   :  { %1217 = vst [vmem:[%s2873_s4 + $0x78] sm:$0xff] %v1211_v20  ;;  %1218 = vst [vmem:[%s2873_s4 + $0x80] sm:$0xff] %v1212_v21  ;;  %v1230_v25 = vld [vmem:[%s1227_s26 + $0x10] sm:$0xff]  ;;  %v1231_v26 = vld [vmem:[%s1227_s26 + $0x18] sm:$0xff]  ;;  %s2700_s11 = sshra.s32 %s1667_s5, 3  ;;  %s1687_s29 = smul.u32 48, %s2676_s9 }
 0x193   :  { %1219 = vst [vmem:[%s2873_s4 + $0x88] sm:$0xff] %v1213_v22  ;;  %v1232_v27 = vld [vmem:[%s1227_s26 + $0x20] sm:$0xff]  ;;  %v1233_v28 = vld [vmem:[%s1227_s26 + $0x28] sm:$0xff]  ;;  %1234 = vst [vmem:[%s2873_s4 + $0x90] sm:$0xff] %v1228_v23  ;;  %s2605_s26 = sshra.s32 %s1658_s10, 3  ;;  %s2617_s10 = sld [smem:[#allocation4 + $0xf]] }
 0x194   :  { %1235 = vst [vmem:[%s2873_s4 + $0x98] sm:$0xff] %v1229_v24  ;;  %1236 = vst [vmem:[%s2873_s4 + $0xa0] sm:$0xff] %v1230_v25  ;;  %v1248_v29 = vld [vmem:[%s1247_s20] sm:$0xff]  ;;  %v1249_v30 = vld [vmem:[%s1247_s20 + $0x8] sm:$0xff]  ;;  %s1685_s8 = smul.u32 48, %s2605_s26  ;;  %s2724_s3 = sshra.s32 %s1670_s27, 3 }
 0x195   :  { %1237 = vst [vmem:[%s2873_s4 + $0xa8] sm:$0xff] %v1231_v26  ;;  %1238 = vst [vmem:[%s2873_s4 + $0xb0] sm:$0xff] %v1232_v27  ;;  %v1250_v31 = vld [vmem:[%s1247_s20 + $0x10] sm:$0xff]  ;;  %v1251_v32 = vld [vmem:[%s1247_s20 + $0x18] sm:$0xff]  ;;  %s1688_s12 = smul.u32 48, %s2700_s11  ;;  %s1407_s15 = scalar_lea.vmem [#allocation2], %s1687_s29 }
 0x196   :  { %1239 = vst [vmem:[%s2873_s4 + $0xb8] sm:$0xff] %v1233_v28  ;;  %v1252_v33 = vld [vmem:[%s1247_s20 + $0x20] sm:$0xff]  ;;  %v1253_v34 = vld [vmem:[%s1247_s20 + $0x28] sm:$0xff]  ;;  %1254 = vst [vmem:[%s2873_s4 + $0xc0] sm:$0xff] %v1248_v29  ;;  %s1367_s28 = scalar_lea.vmem [#allocation2], %s1685_s8  ;;  %s1689_s8 = smul.u32 48, %s2724_s3 }
 0x197   :  { %1255 = vst [vmem:[%s2873_s4 + $0xc8] sm:$0xff] %v1249_v30  ;;  %1256 = vst [vmem:[%s2873_s4 + $0xd0] sm:$0xff] %v1250_v31  ;;  %v1268_v35 = vld [vmem:[%s1267_s19] sm:$0xff]  ;;  %v1269_v36 = vld [vmem:[%s1267_s19 + $0x8] sm:$0xff]  ;;  %s1427_s21 = scalar_lea.vmem [#allocation2], %s1688_s12 }
 0x198   :  { %1257 = vst [vmem:[%s2873_s4 + $0xd8] sm:$0xff] %v1251_v32  ;;  %1258 = vst [vmem:[%s2873_s4 + $0xe0] sm:$0xff] %v1252_v33  ;;  %v1270_v37 = vld [vmem:[%s1267_s19 + $0x10] sm:$0xff]  ;;  %v1271_v38 = vld [vmem:[%s1267_s19 + $0x18] sm:$0xff] }
 0x199   :  { %1259 = vst [vmem:[%s2873_s4 + $0xe8] sm:$0xff] %v1253_v34  ;;  %v1272_v39 = vld [vmem:[%s1267_s19 + $0x20] sm:$0xff]  ;;  %v1273_v40 = vld [vmem:[%s1267_s19 + $0x28] sm:$0xff]  ;;  %1274 = vst [vmem:[%s2873_s4 + $0xf0] sm:$0xff] %v1268_v35  ;;  %s1673_s13 = sshll.u32 %s2617_s10, 3 }
 0x19a   :  { %1275 = vst [vmem:[%s2873_s4 + $0xf8] sm:$0xff] %v1269_v36  ;;  %1276 = vst [vmem:[%s2873_s4 + $0x100] sm:$0xff] %v1270_v37  ;;  %v1288_v41 = vld [vmem:[%s1287_s14] sm:$0xff]  ;;  %v1289_v42 = vld [vmem:[%s1287_s14 + $0x8] sm:$0xff]  ;;  %s2747_s5 = sshra.s32 %s1673_s13, 3 }
 0x19b   :  { %1277 = vst [vmem:[%s2873_s4 + $0x108] sm:$0xff] %v1271_v38  ;;  %1278 = vst [vmem:[%s2873_s4 + $0x110] sm:$0xff] %v1272_v39  ;;  %v1290_v43 = vld [vmem:[%s1287_s14 + $0x10] sm:$0xff]  ;;  %v1291_v44 = vld [vmem:[%s1287_s14 + $0x18] sm:$0xff]  ;;  %s1690_s16 = smul.u32 48, %s2747_s5 }
 0x19c   :  { %1279 = vst [vmem:[%s2873_s4 + $0x118] sm:$0xff] %v1273_v40  ;;  %v1292_v45 = vld [vmem:[%s1287_s14 + $0x20] sm:$0xff]  ;;  %v1293_v46 = vld [vmem:[%s1287_s14 + $0x28] sm:$0xff]  ;;  %1294 = vst [vmem:[%s2873_s4 + $0x120] sm:$0xff] %v1288_v41 }
 0x19d   :  { %1295 = vst [vmem:[%s2873_s4 + $0x128] sm:$0xff] %v1289_v42  ;;  %1296 = vst [vmem:[%s2873_s4 + $0x130] sm:$0xff] %v1290_v43  ;;  %v1308_v47 = vld [vmem:[%s1307_s17] sm:$0xff]  ;;  %v1309_v48 = vld [vmem:[%s1307_s17 + $0x8] sm:$0xff] }
 0x19e   :  { %1297 = vst [vmem:[%s2873_s4 + $0x138] sm:$0xff] %v1291_v44  ;;  %1298 = vst [vmem:[%s2873_s4 + $0x140] sm:$0xff] %v1292_v45  ;;  %v1310_v50 = vld [vmem:[%s1307_s17 + $0x10] sm:$0xff]  ;;  %v1311_v51 = vld [vmem:[%s1307_s17 + $0x18] sm:$0xff] }
 0x19f   :  { %1299 = vst [vmem:[%s2873_s4 + $0x148] sm:$0xff] %v1293_v46  ;;  %v1312_v53 = vld [vmem:[%s1307_s17 + $0x20] sm:$0xff]  ;;  %v1313_v54 = vld [vmem:[%s1307_s17 + $0x28] sm:$0xff]  ;;  %1314 = vst [vmem:[%s2873_s4 + $0x150] sm:$0xff] %v1308_v47 }
 0x1a0   :  { %1315 = vst [vmem:[%s2873_s4 + $0x158] sm:$0xff] %v1309_v48  ;;  %1316 = vst [vmem:[%s2873_s4 + $0x160] sm:$0xff] %v1310_v50  ;;  %v1328_v59 = vld [vmem:[%s1327_s0] sm:$0xff]  ;;  %v1329_v60 = vld [vmem:[%s1327_s0 + $0x8] sm:$0xff] }
 0x1a1   :  { %1317 = vst [vmem:[%s2873_s4 + $0x168] sm:$0xff] %v1311_v51  ;;  %1318 = vst [vmem:[%s2873_s4 + $0x170] sm:$0xff] %v1312_v53  ;;  %v1330_v61 = vld [vmem:[%s1327_s0 + $0x10] sm:$0xff]  ;;  %v1331_v62 = vld [vmem:[%s1327_s0 + $0x18] sm:$0xff] }
 0x1a2   :  { %1319 = vst [vmem:[%s2873_s4 + $0x178] sm:$0xff] %v1313_v54  ;;  %v1332_v63 = vld [vmem:[%s1327_s0 + $0x20] sm:$0xff]  ;;  %v1333_v0 = vld [vmem:[%s1327_s0 + $0x28] sm:$0xff]  ;;  %1334 = vst [vmem:[%s2873_s4 + $0x180] sm:$0xff] %v1328_v59  ;;  %s1387_s0 = scalar_lea.vmem [#allocation2], %s1686_s1 }
 0x1a3   :  { %1335 = vst [vmem:[%s2873_s4 + $0x188] sm:$0xff] %v1329_v60  ;;  %1336 = vst [vmem:[%s2873_s4 + $0x190] sm:$0xff] %v1330_v61  ;;  %v1348_v1 = vld [vmem:[%s1347_s30] sm:$0xff]  ;;  %v1349_v2 = vld [vmem:[%s1347_s30 + $0x8] sm:$0xff] }
 0x1a4   :  { %1337 = vst [vmem:[%s2873_s4 + $0x198] sm:$0xff] %v1331_v62  ;;  %1338 = vst [vmem:[%s2873_s4 + $0x1a0] sm:$0xff] %v1332_v63  ;;  %v1350_v3 = vld [vmem:[%s1347_s30 + $0x10] sm:$0xff]  ;;  %v1351_v4 = vld [vmem:[%s1347_s30 + $0x18] sm:$0xff] }
 0x1a5   :  { %1339 = vst [vmem:[%s2873_s4 + $0x1a8] sm:$0xff] %v1333_v0  ;;  %v1352_v5 = vld [vmem:[%s1347_s30 + $0x20] sm:$0xff]  ;;  %v1353_v6 = vld [vmem:[%s1347_s30 + $0x28] sm:$0xff]  ;;  %1354 = vst [vmem:[%s2873_s4 + $0x1b0] sm:$0xff] %v1348_v1 }
 0x1a6   :  { %1355 = vst [vmem:[%s2873_s4 + $0x1b8] sm:$0xff] %v1349_v2  ;;  %1356 = vst [vmem:[%s2873_s4 + $0x1c0] sm:$0xff] %v1350_v3  ;;  %v1368_v7 = vld [vmem:[%s1367_s28] sm:$0xff]  ;;  %v1369_v8 = vld [vmem:[%s1367_s28 + $0x8] sm:$0xff] }
 0x1a7   :  { %1357 = vst [vmem:[%s2873_s4 + $0x1c8] sm:$0xff] %v1351_v4  ;;  %1358 = vst [vmem:[%s2873_s4 + $0x1d0] sm:$0xff] %v1352_v5  ;;  %v1370_v55 = vld [vmem:[%s1367_s28 + $0x10] sm:$0xff]  ;;  %v1371_v56 = vld [vmem:[%s1367_s28 + $0x18] sm:$0xff] }
 0x1a8   :  { %1359 = vst [vmem:[%s2873_s4 + $0x1d8] sm:$0xff] %v1353_v6  ;;  %v1372_v9 = vld [vmem:[%s1367_s28 + $0x20] sm:$0xff]  ;;  %v1373_v49 = vld [vmem:[%s1367_s28 + $0x28] sm:$0xff]  ;;  %1374 = vst [vmem:[%s2873_s4 + $0x1e0] sm:$0xff] %v1368_v7 }
 0x1a9   :  { %1375 = vst [vmem:[%s2873_s4 + $0x1e8] sm:$0xff] %v1369_v8  ;;  %1376 = vst [vmem:[%s2873_s4 + $0x1f0] sm:$0xff] %v1370_v55  ;;  %v1388_v10 = vld [vmem:[%s1387_s0] sm:$0xff]  ;;  %v1389_v11 = vld [vmem:[%s1387_s0 + $0x8] sm:$0xff] }
 0x1aa   :  { %1377 = vst [vmem:[%s2873_s4 + $0x1f8] sm:$0xff] %v1371_v56  ;;  %1378 = vst [vmem:[%s2873_s4 + $0x200] sm:$0xff] %v1372_v9  ;;  %v1390_v12 = vld [vmem:[%s1387_s0 + $0x10] sm:$0xff]  ;;  %v1391_v57 = vld [vmem:[%s1387_s0 + $0x18] sm:$0xff] }
 0x1ab   :  { %1379 = vst [vmem:[%s2873_s4 + $0x208] sm:$0xff] %v1373_v49  ;;  %v1392_v58 = vld [vmem:[%s1387_s0 + $0x20] sm:$0xff]  ;;  %v1393_v13 = vld [vmem:[%s1387_s0 + $0x28] sm:$0xff]  ;;  %1394 = vst [vmem:[%s2873_s4 + $0x210] sm:$0xff] %v1388_v10  ;;  %s1467_s0 = scalar_lea.vmem [#allocation2], %s1690_s16 }
 0x1ac   :  { %1395 = vst [vmem:[%s2873_s4 + $0x218] sm:$0xff] %v1389_v11  ;;  %1396 = vst [vmem:[%s2873_s4 + $0x220] sm:$0xff] %v1390_v12  ;;  %v1408_v14 = vld [vmem:[%s1407_s15] sm:$0xff]  ;;  %v1409_v15 = vld [vmem:[%s1407_s15 + $0x8] sm:$0xff] }
 0x1ad   :  { %1397 = vst [vmem:[%s2873_s4 + $0x228] sm:$0xff] %v1391_v57  ;;  %1398 = vst [vmem:[%s2873_s4 + $0x230] sm:$0xff] %v1392_v58  ;;  %v1410_v16 = vld [vmem:[%s1407_s15 + $0x10] sm:$0xff]  ;;  %v1411_v52 = vld [vmem:[%s1407_s15 + $0x18] sm:$0xff] }
 0x1ae   :  { %1399 = vst [vmem:[%s2873_s4 + $0x238] sm:$0xff] %v1393_v13  ;;  %v1412_v17 = vld [vmem:[%s1407_s15 + $0x20] sm:$0xff]  ;;  %v1413_v18 = vld [vmem:[%s1407_s15 + $0x28] sm:$0xff]  ;;  %1414 = vst [vmem:[%s2873_s4 + $0x240] sm:$0xff] %v1408_v14  ;;  %s1447_s15 = scalar_lea.vmem [#allocation2], %s1689_s8 }
 0x1af   :  { %1415 = vst [vmem:[%s2873_s4 + $0x248] sm:$0xff] %v1409_v15  ;;  %1416 = vst [vmem:[%s2873_s4 + $0x250] sm:$0xff] %v1410_v16  ;;  %v1428_v19 = vld [vmem:[%s1427_s21] sm:$0xff]  ;;  %v1429_v20 = vld [vmem:[%s1427_s21 + $0x8] sm:$0xff] }
 0x1b0   :  { %1417 = vst [vmem:[%s2873_s4 + $0x258] sm:$0xff] %v1411_v52  ;;  %1418 = vst [vmem:[%s2873_s4 + $0x260] sm:$0xff] %v1412_v17  ;;  %v1430_v21 = vld [vmem:[%s1427_s21 + $0x10] sm:$0xff]  ;;  %v1431_v22 = vld [vmem:[%s1427_s21 + $0x18] sm:$0xff] }
 0x1b1   :  { %1419 = vst [vmem:[%s2873_s4 + $0x268] sm:$0xff] %v1413_v18  ;;  %v1432_v23 = vld [vmem:[%s1427_s21 + $0x20] sm:$0xff]  ;;  %v1433_v24 = vld [vmem:[%s1427_s21 + $0x28] sm:$0xff]  ;;  %1434 = vst [vmem:[%s2873_s4 + $0x270] sm:$0xff] %v1428_v19 }
 0x1b2   :  { %1435 = vst [vmem:[%s2873_s4 + $0x278] sm:$0xff] %v1429_v20  ;;  %1436 = vst [vmem:[%s2873_s4 + $0x280] sm:$0xff] %v1430_v21  ;;  %v1448_v25 = vld [vmem:[%s1447_s15] sm:$0xff]  ;;  %v1449_v26 = vld [vmem:[%s1447_s15 + $0x8] sm:$0xff] }
 0x1b3   :  { %1437 = vst [vmem:[%s2873_s4 + $0x288] sm:$0xff] %v1431_v22  ;;  %1438 = vst [vmem:[%s2873_s4 + $0x290] sm:$0xff] %v1432_v23  ;;  %v1450_v27 = vld [vmem:[%s1447_s15 + $0x10] sm:$0xff]  ;;  %v1451_v28 = vld [vmem:[%s1447_s15 + $0x18] sm:$0xff] }
 0x1b4   :  { %1439 = vst [vmem:[%s2873_s4 + $0x298] sm:$0xff] %v1433_v24  ;;  %v1452_v29 = vld [vmem:[%s1447_s15 + $0x20] sm:$0xff]  ;;  %v1453_v30 = vld [vmem:[%s1447_s15 + $0x28] sm:$0xff]  ;;  %1454 = vst [vmem:[%s2873_s4 + $0x2a0] sm:$0xff] %v1448_v25 }
 0x1b5   :  { %1455 = vst [vmem:[%s2873_s4 + $0x2a8] sm:$0xff] %v1449_v26  ;;  %1456 = vst [vmem:[%s2873_s4 + $0x2b0] sm:$0xff] %v1450_v27  ;;  %v1468_v31 = vld [vmem:[%s1467_s0] sm:$0xff]  ;;  %v1469_v32 = vld [vmem:[%s1467_s0 + $0x8] sm:$0xff] }
 0x1b6   :  { %1457 = vst [vmem:[%s2873_s4 + $0x2b8] sm:$0xff] %v1451_v28  ;;  %1458 = vst [vmem:[%s2873_s4 + $0x2c0] sm:$0xff] %v1452_v29  ;;  %v1470_v33 = vld [vmem:[%s1467_s0 + $0x10] sm:$0xff]  ;;  %v1471_v34 = vld [vmem:[%s1467_s0 + $0x18] sm:$0xff] }
 0x1b7   :  { %1459 = vst [vmem:[%s2873_s4 + $0x2c8] sm:$0xff] %v1453_v30  ;;  %v1472_v35 = vld [vmem:[%s1467_s0 + $0x20] sm:$0xff]  ;;  %v1473_v36 = vld [vmem:[%s1467_s0 + $0x28] sm:$0xff]  ;;  %1474 = vst [vmem:[%s2873_s4 + $0x2d0] sm:$0xff] %v1468_v31 }
 0x1b8   :  { %1475 = vst [vmem:[%s2873_s4 + $0x2d8] sm:$0xff] %v1469_v32  ;;  %1476 = vst [vmem:[%s2873_s4 + $0x2e0] sm:$0xff] %v1470_v33 }
 0x1b9   :  { %1477 = vst [vmem:[%s2873_s4 + $0x2e8] sm:$0xff] %v1471_v34  ;;  %1478 = vst [vmem:[%s2873_s4 + $0x2f0] sm:$0xff] %v1472_v35 }
 0x1ba   :  { %1479 = vst [vmem:[%s2873_s4 + $0x2f8] sm:$0xff] %v1473_v36 }

</bundles_post_ra>
